<compile_context>
chip_gen: v5e
topology: v5e:2x2
jax: 0.10.0
libtpu: 0.0.40
codegen_flags: <defaults>
</compile_context>

<pallas_src>
import jax
import jax.numpy as jnp
from jax.experimental import pallas as pl
from jax.experimental.pallas import tpu as pltpu


def rescbam_kernel(x_ref, w1_ref, b1_ref, w2_ref, b2_ref, wfc1_ref, wfc2_ref,
                   out_ref):
    """Fused ResCBAM block, NCL layout.

    x_ref   : (Bb, C, L)   input block (also the residual)
    w1_ref  : (K, C, C)    conv1 weight, tap-major, (Cout, Cin) per tap, BN1 scale folded
    b1_ref  : (C, 1)       folded conv1/BN1 bias
    w2_ref  : (K, C, C)    conv2 weight, BN2 scale folded
    b2_ref  : (C, 1)       folded conv2/BN2 bias
    wfc1_ref: (H, C)       channel-attention fc1 (no bias)
    wfc2_ref: (C, H)       channel-attention fc2 (no bias)
    out_ref : (Bb, C, L)
    """
    Bb, C, L = out_ref.shape
    K = w1_ref.shape[0]
    pad_l = (K - 1) // 2

    # Per-tap lane-validity masks for 'same' padding (hoisted: shared across the
    # batch loop and both convs).
    lane = jax.lax.broadcasted_iota(jnp.int32, (C, L), 1)
    masks = []
    for k in range(K):
        d = k - pad_l
        if d == 0:
            masks.append(None)
        else:
            masks.append((lane + d >= 0) & (lane + d < L))

    w1 = w1_ref[...]
    w2 = w2_ref[...]
    b1 = b1_ref[...]
    b2 = b2_ref[...]
    wfc1 = wfc1_ref[...]
    wfc2 = wfc2_ref[...]
    col2 = jax.lax.broadcasted_iota(jnp.int32, (C, 2), 1)

    def conv_same(v, w, b):
        # v: (C, L) f32; w: (K, Cout, Cin); b: (Cout, 1)
        acc = jnp.zeros((C, L), jnp.float32)
        for k in range(K):
            d = k - pad_l
            if d == 0:
                s = v
            else:
                # s[:, l] = v[:, l + d] (zero outside [0, L)):
                # pltpu.roll follows jnp.roll semantics, so shift by -d.
                s = pltpu.roll(v, (-d) % L, axis=1)
                s = jnp.where(masks[k], s, 0.0)
            acc += jnp.dot(w[k], s, preferred_element_type=jnp.float32)
        return acc + b

    for bi in range(Bb):
        x = x_ref[bi].astype(jnp.float32)                       # (C, L)

        # conv1 + (folded) bn1 + ReLU
        out = jnp.maximum(conv_same(x, w1, b1), 0.0)
        # conv2 + (folded) bn2
        out = conv_same(out, w2, b2)

        # ChannelAttention: pool over L (lane reduction), one MLP pass on [avg|max].
        avg = jnp.mean(out, axis=1, keepdims=True)              # (C, 1)
        mx = jnp.max(out, axis=1, keepdims=True)                # (C, 1)
        pooled = jnp.where(col2 == 0, avg, mx)                  # (C, 2)
        h = jnp.maximum(
            jnp.dot(wfc1, pooled, preferred_element_type=jnp.float32), 0.0)  # (H, 2)
        y = jnp.dot(wfc2, h, preferred_element_type=jnp.float32)             # (C, 2)
        att = jax.nn.sigmoid(jnp.sum(y, axis=1, keepdims=True))              # (C, 1)
        out = out * att

        # residual add + ReLU
        out = jnp.maximum(out + x, 0.0)
        out_ref[bi] = out.astype(out_ref.dtype)


def _tensorcores_per_chip():
    """Best-effort count of TensorCores addressable by one program.

    v7x (and v4/v5p megacore) expose 2 TensorCores; v5e/v6e expose 1.  Only used
    to pick the grid split; the fallback (1) is always correct.
    """
    try:
        kind = jax.devices()[0].device_kind.lower()
    except Exception:
        return 1
    if "7" in kind or "v4" in kind or "v5p" in kind:
        return 2
    return 1


def rescbam_forward(x, params, *, batch_block=None):
    """x: (N, C, L) float32, PyTorch NCL layout (no wrapper transposes/pads)."""
    N, C, L = x.shape
    K = params["w1"].shape[0]
    H = params["wfc1"].shape[0]

    if batch_block is None:
        tc = _tensorcores_per_chip()
        # Single grid step on single-TC chips (minimal per-step overhead); split the
        # batch across cores on multi-TC chips.
        batch_block = N // tc if (tc > 1 and N % tc == 0) else N
    assert N % batch_block == 0, "batch_block must divide the batch size"
    grid = (N // batch_block,)

    grid_spec = pltpu.PrefetchScalarGridSpec(
        num_scalar_prefetch=0,
        grid=grid,
        in_specs=[
            pl.BlockSpec((batch_block, C, L), lambda n: (n, 0, 0)),
            pl.BlockSpec((K, C, C), lambda n: (0, 0, 0)),
            pl.BlockSpec((C, 1), lambda n: (0, 0)),
            pl.BlockSpec((K, C, C), lambda n: (0, 0, 0)),
            pl.BlockSpec((C, 1), lambda n: (0, 0)),
            pl.BlockSpec((H, C), lambda n: (0, 0)),
            pl.BlockSpec((C, H), lambda n: (0, 0)),
        ],
        out_specs=pl.BlockSpec((batch_block, C, L), lambda n: (n, 0, 0)),
    )

    return pl.pallas_call(
        rescbam_kernel,
        out_shape=jax.ShapeDtypeStruct((N, C, L), x.dtype),
        grid_spec=grid_spec,
        compiler_params=pltpu.CompilerParams(
            dimension_semantics=("parallel",)),
    )(x, params["w1"], params["b1"], params["w2"], params["b2"],
      params["wfc1"], params["wfc2"])


def ref_forward(x, p):
    """Pure-JAX reference of the PyTorch ResCBAM forward (inference-mode BN)."""
    eps = p["eps"]

    def conv_bn(v, w, b, gamma, beta, mean, var):
        y = jax.lax.conv_general_dilated(
            v, w, window_strides=(1,), padding="SAME",
            dimension_numbers=("NCH", "OIH", "NCH")) + b[None, :, None]
        y = (y - mean[None, :, None]) / jnp.sqrt(var + eps)[None, :, None]
        return y * gamma[None, :, None] + beta[None, :, None]

    out = jax.nn.relu(conv_bn(x, p["w1_pt"], p["b1"],
                              p["g1"], p["be1"], p["m1"], p["v1"]))
    out = conv_bn(out, p["w2_pt"], p["b2"], p["g2"], p["be2"], p["m2"], p["v2"])

    avg = out.mean(axis=2, keepdims=True)                       # (N, C, 1)
    mx = out.max(axis=2, keepdims=True)

    def fc(v):
        h = jax.nn.relu(jnp.einsum("hc,ncx->nhx", p["wfc1_pt"], v))
        return jnp.einsum("ch,nhx->ncx", p["wfc2_pt"], h)

    att = jax.nn.sigmoid(fc(avg) + fc(mx))
    return jax.nn.relu(out * att + x)


def make_params(key, C, K, reduction):
    """Random PyTorch-layout params + the folded kernel params."""
    H = C // reduction
    eps = 1e-5
    ks = jax.random.split(key, 14)
    n = jax.random.normal
    u = jax.random.uniform

    w1_pt = 0.1 * n(ks[0], (C, C, K), jnp.float32)   # conv1 weight (Cout, Cin, K)
    b1 = 0.1 * n(ks[1], (C,), jnp.float32)
    g1 = 0.5 + u(ks[2], (C,), jnp.float32)
    be1 = 0.1 * n(ks[3], (C,), jnp.float32)
    m1 = 0.1 * n(ks[4], (C,), jnp.float32)
    v1 = 0.5 + u(ks[5], (C,), jnp.float32)

    w2_pt = 0.1 * n(ks[6], (C, C, K), jnp.float32)   # conv2 weight (Cout, Cin, K)
    b2 = 0.1 * n(ks[7], (C,), jnp.float32)
    g2 = 0.5 + u(ks[8], (C,), jnp.float32)
    be2 = 0.1 * n(ks[9], (C,), jnp.float32)
    m2 = 0.1 * n(ks[10], (C,), jnp.float32)
    v2 = 0.5 + u(ks[11], (C,), jnp.float32)

    wfc1_pt = 0.2 * n(ks[12], (H, C), jnp.float32)   # Conv1d(C, H, 1, bias=False)
    wfc2_pt = 0.2 * n(ks[13], (C, H), jnp.float32)   # Conv1d(H, C, 1, bias=False)

    # Fold BN (running stats) and conv bias: y = (conv(x)+b - mean)*s*gamma... ->
    # weight *= s (per out-channel), bias = (b - mean)*s + beta, s = gamma/sqrt(var+eps).
    s1 = g1 / jnp.sqrt(v1 + eps)
    s2 = g2 / jnp.sqrt(v2 + eps)

    kernel_params = {
        "w1": jnp.transpose(w1_pt * s1[:, None, None], (2, 0, 1)),  # (K, Cout, Cin)
        "b1": ((b1 - m1) * s1 + be1)[:, None],                      # (C, 1)
        "w2": jnp.transpose(w2_pt * s2[:, None, None], (2, 0, 1)),  # (K, Cout, Cin)
        "b2": ((b2 - m2) * s2 + be2)[:, None],                      # (C, 1)
        "wfc1": wfc1_pt,                                            # (H, C)
        "wfc2": wfc2_pt,                                            # (C, H)
    }
    raw_params = {
        "w1_pt": w1_pt, "b1": b1, "g1": g1, "be1": be1, "m1": m1, "v1": v1,
        "w2_pt": w2_pt, "b2": b2, "g2": g2, "be2": be2, "m2": m2, "v2": v2,
        "wfc1_pt": wfc1_pt, "wfc2_pt": wfc2_pt, "eps": eps,
    }
    return kernel_params, raw_params


if __name__ == "__main__":
    # Small shapes consistent with the ResCBAM(cbam=True, rf=2) blocks of the model
    # (real model uses C=1024, L=50; keep it small here, L=128 for full lane width).
    N, C, L, K, RF = 2, 32, 128, 3, 2

    key = jax.random.PRNGKey(0)
    k_x, k_p = jax.random.split(key)
    x = jax.random.normal(k_x, (N, C, L), jnp.float32)   # PyTorch NCL input

    kernel_params, raw_params = make_params(k_p, C, K, RF)

    out = jax.block_until_ready(rescbam_forward(x, kernel_params))
    ref = jax.block_until_ready(ref_forward(x, raw_params))

    assert out.shape == (N, C, L)
    max_err = float(jnp.max(jnp.abs(out - ref)))
    assert jnp.allclose(out, ref, atol=1e-4, rtol=1e-4), max_err

    print("KERNEL_OK")
</pallas_src>

<mosaic_0001>
module attributes {stable_mosaic.version = 11 : i64} {
  func.func @rescbam_kernel(%arg0: i32, %arg1: memref<2x32x128xf32, #tpu.memory_space<vmem>>, %arg2: memref<3x32x32xf32, #tpu.memory_space<vmem>>, %arg3: memref<32x1xf32, #tpu.memory_space<vmem>>, %arg4: memref<3x32x32xf32, #tpu.memory_space<vmem>>, %arg5: memref<32x1xf32, #tpu.memory_space<vmem>>, %arg6: memref<16x32xf32, #tpu.memory_space<vmem>>, %arg7: memref<32x16xf32, #tpu.memory_space<vmem>>, %arg8: memref<2x32x128xf32, #tpu.memory_space<vmem>>) attributes {dimension_semantics = [#tpu.dimension_semantics<parallel>], iteration_bounds = array<i64: 1>, scalar_prefetch = 0 : i64, scratch_operands = 0 : i64, tpu.core_type = #tpu.core_type<tc>, window_params = [{transform_indices = @transform_0, window_bounds = array<i64: 2, 32, 128>}, {pipeline_mode = #tpu.pipeline_mode<synchronous>, transform_indices = @transform_1, window_bounds = array<i64: 3, 32, 32>}, {pipeline_mode = #tpu.pipeline_mode<synchronous>, transform_indices = @transform_2, window_bounds = array<i64: 32, 1>}, {pipeline_mode = #tpu.pipeline_mode<synchronous>, transform_indices = @transform_3, window_bounds = array<i64: 3, 32, 32>}, {pipeline_mode = #tpu.pipeline_mode<synchronous>, transform_indices = @transform_4, window_bounds = array<i64: 32, 1>}, {pipeline_mode = #tpu.pipeline_mode<synchronous>, transform_indices = @transform_5, window_bounds = array<i64: 16, 32>}, {pipeline_mode = #tpu.pipeline_mode<synchronous>, transform_indices = @transform_6, window_bounds = array<i64: 32, 16>}, {transform_indices = @transform_7, window_bounds = array<i64: 2, 32, 128>}]} {
    %0 = tpu.iota {dimensions = array<i32: 1>} : vector<32x128xi32>
    %c-1_i32 = arith.constant -1 : i32
    %1 = vector.broadcast %c-1_i32 : i32 to vector<32x128xi32>
    %2 = arith.addi %0, %1 : vector<32x128xi32>
    %c0_i32 = arith.constant 0 : i32
    %3 = vector.broadcast %c0_i32 : i32 to vector<32x128xi32>
    %4 = arith.cmpi sge, %2, %3 : vector<32x128xi32>
    %c-1_i32_0 = arith.constant -1 : i32
    %5 = vector.broadcast %c-1_i32_0 : i32 to vector<32x128xi32>
    %6 = arith.addi %0, %5 : vector<32x128xi32>
    %c128_i32 = arith.constant 128 : i32
    %7 = vector.broadcast %c128_i32 : i32 to vector<32x128xi32>
    %8 = arith.cmpi slt, %6, %7 : vector<32x128xi32>
    %9 = arith.andi %4, %8 : vector<32x128xi1>
    %c1_i32 = arith.constant 1 : i32
    %10 = vector.broadcast %c1_i32 : i32 to vector<32x128xi32>
    %11 = arith.addi %0, %10 : vector<32x128xi32>
    %c0_i32_1 = arith.constant 0 : i32
    %12 = vector.broadcast %c0_i32_1 : i32 to vector<32x128xi32>
    %13 = arith.cmpi sge, %11, %12 : vector<32x128xi32>
    %c1_i32_2 = arith.constant 1 : i32
    %14 = vector.broadcast %c1_i32_2 : i32 to vector<32x128xi32>
    %15 = arith.addi %0, %14 : vector<32x128xi32>
    %c128_i32_3 = arith.constant 128 : i32
    %16 = vector.broadcast %c128_i32_3 : i32 to vector<32x128xi32>
    %17 = arith.cmpi slt, %15, %16 : vector<32x128xi32>
    %18 = arith.andi %13, %17 : vector<32x128xi1>
    %c0 = arith.constant 0 : index
    %c0_4 = arith.constant 0 : index
    %c0_5 = arith.constant 0 : index
    %19 = vector.load %arg2[%c0, %c0_4, %c0_5] : memref<3x32x32xf32, #tpu.memory_space<vmem>>, vector<3x32x32xf32>
    %c0_6 = arith.constant 0 : index
    %c0_7 = arith.constant 0 : index
    %c0_8 = arith.constant 0 : index
    %20 = vector.load %arg4[%c0_6, %c0_7, %c0_8] : memref<3x32x32xf32, #tpu.memory_space<vmem>>, vector<3x32x32xf32>
    %c0_9 = arith.constant 0 : index
    %c0_10 = arith.constant 0 : index
    %21 = vector.load %arg3[%c0_9, %c0_10] : memref<32x1xf32, #tpu.memory_space<vmem>>, vector<32x1xf32>
    %c0_11 = arith.constant 0 : index
    %c0_12 = arith.constant 0 : index
    %22 = vector.load %arg5[%c0_11, %c0_12] : memref<32x1xf32, #tpu.memory_space<vmem>>, vector<32x1xf32>
    %c0_13 = arith.constant 0 : index
    %c0_14 = arith.constant 0 : index
    %23 = vector.load %arg6[%c0_13, %c0_14] : memref<16x32xf32, #tpu.memory_space<vmem>>, vector<16x32xf32>
    %c0_15 = arith.constant 0 : index
    %c0_16 = arith.constant 0 : index
    %24 = vector.load %arg7[%c0_15, %c0_16] : memref<32x16xf32, #tpu.memory_space<vmem>>, vector<32x16xf32>
    %25 = tpu.iota {dimensions = array<i32: 1>} : vector<32x2xi32>
    %c0_17 = arith.constant 0 : index
    %c0_18 = arith.constant 0 : index
    %c0_19 = arith.constant 0 : index
    %26 = vector.load %arg1[%c0_17, %c0_18, %c0_19] : memref<2x32x128xf32, #tpu.memory_space<vmem>>, vector<1x32x128xf32>
    %27 = vector.shape_cast %26 : vector<1x32x128xf32> to vector<32x128xf32>
    %cst = arith.constant 0.000000e+00 : f32
    %28 = vector.broadcast %cst : f32 to vector<32x128xf32>
    %c1_i32_20 = arith.constant 1 : i32
    %29 = tpu.dynamic_rotate %27 by %c1_i32_20 dim 1 : vector<32x128xf32>, i32 -> vector<32x128xf32>
    %cst_21 = arith.constant 0.000000e+00 : f32
    %30 = vector.broadcast %cst_21 : f32 to vector<32x128xf32>
    %31 = arith.select %9, %29, %30 : vector<32x128xi1>, vector<32x128xf32>
    %32 = vector.extract_strided_slice %19 {offsets = [0, 0, 0], sizes = [1, 32, 32], strides = [1, 1, 1]} : vector<3x32x32xf32> to vector<1x32x32xf32>
    %33 = vector.shape_cast %32 : vector<1x32x32xf32> to vector<32x32xf32>
    %cst_22 = arith.constant dense<0.000000e+00> : vector<32x128xf32>
    %34 = tpu.matmul %33, %31, %cst_22 {dimension_numbers = #tpu.dot_dimension_numbers<[1], [0], [0], [1], [0, 0, 1, 1], [], []>} : vector<32x32xf32>, vector<32x128xf32>, vector<32x128xf32> -> vector<32x128xf32>
    %35 = arith.addf %28, %34 : vector<32x128xf32>
    %36 = vector.extract_strided_slice %19 {offsets = [1, 0, 0], sizes = [1, 32, 32], strides = [1, 1, 1]} : vector<3x32x32xf32> to vector<1x32x32xf32>
    %37 = vector.shape_cast %36 : vector<1x32x32xf32> to vector<32x32xf32>
    %cst_23 = arith.constant dense<0.000000e+00> : vector<32x128xf32>
    %38 = tpu.matmul %37, %27, %cst_23 {dimension_numbers = #tpu.dot_dimension_numbers<[1], [0], [0], [1], [0, 0, 1, 1], [], []>} : vector<32x32xf32>, vector<32x128xf32>, vector<32x128xf32> -> vector<32x128xf32>
    %39 = arith.addf %35, %38 : vector<32x128xf32>
    %c127_i32 = arith.constant 127 : i32
    %40 = tpu.dynamic_rotate %27 by %c127_i32 dim 1 : vector<32x128xf32>, i32 -> vector<32x128xf32>
    %cst_24 = arith.constant 0.000000e+00 : f32
    %41 = vector.broadcast %cst_24 : f32 to vector<32x128xf32>
    %42 = arith.select %18, %40, %41 : vector<32x128xi1>, vector<32x128xf32>
    %43 = vector.extract_strided_slice %19 {offsets = [2, 0, 0], sizes = [1, 32, 32], strides = [1, 1, 1]} : vector<3x32x32xf32> to vector<1x32x32xf32>
    %44 = vector.shape_cast %43 : vector<1x32x32xf32> to vector<32x32xf32>
    %cst_25 = arith.constant dense<0.000000e+00> : vector<32x128xf32>
    %45 = tpu.matmul %44, %42, %cst_25 {dimension_numbers = #tpu.dot_dimension_numbers<[1], [0], [0], [1], [0, 0, 1, 1], [], []>} : vector<32x32xf32>, vector<32x128xf32>, vector<32x128xf32> -> vector<32x128xf32>
    %46 = arith.addf %39, %45 : vector<32x128xf32>
    %47 = vector.broadcast %21 : vector<32x1xf32> to vector<32x128xf32>
    %48 = arith.addf %46, %47 : vector<32x128xf32>
    %cst_26 = arith.constant 0.000000e+00 : f32
    %49 = vector.broadcast %cst_26 : f32 to vector<32x128xf32>
    %50 = arith.maximumf %48, %49 : vector<32x128xf32>
    %cst_27 = arith.constant 0.000000e+00 : f32
    %51 = vector.broadcast %cst_27 : f32 to vector<32x128xf32>
    %c1_i32_28 = arith.constant 1 : i32
    %52 = tpu.dynamic_rotate %50 by %c1_i32_28 dim 1 : vector<32x128xf32>, i32 -> vector<32x128xf32>
    %cst_29 = arith.constant 0.000000e+00 : f32
    %53 = vector.broadcast %cst_29 : f32 to vector<32x128xf32>
    %54 = arith.select %9, %52, %53 : vector<32x128xi1>, vector<32x128xf32>
    %55 = vector.extract_strided_slice %20 {offsets = [0, 0, 0], sizes = [1, 32, 32], strides = [1, 1, 1]} : vector<3x32x32xf32> to vector<1x32x32xf32>
    %56 = vector.shape_cast %55 : vector<1x32x32xf32> to vector<32x32xf32>
    %cst_30 = arith.constant dense<0.000000e+00> : vector<32x128xf32>
    %57 = tpu.matmul %56, %54, %cst_30 {dimension_numbers = #tpu.dot_dimension_numbers<[1], [0], [0], [1], [0, 0, 1, 1], [], []>} : vector<32x32xf32>, vector<32x128xf32>, vector<32x128xf32> -> vector<32x128xf32>
    %58 = arith.addf %51, %57 : vector<32x128xf32>
    %59 = vector.extract_strided_slice %20 {offsets = [1, 0, 0], sizes = [1, 32, 32], strides = [1, 1, 1]} : vector<3x32x32xf32> to vector<1x32x32xf32>
    %60 = vector.shape_cast %59 : vector<1x32x32xf32> to vector<32x32xf32>
    %cst_31 = arith.constant dense<0.000000e+00> : vector<32x128xf32>
    %61 = tpu.matmul %60, %50, %cst_31 {dimension_numbers = #tpu.dot_dimension_numbers<[1], [0], [0], [1], [0, 0, 1, 1], [], []>} : vector<32x32xf32>, vector<32x128xf32>, vector<32x128xf32> -> vector<32x128xf32>
    %62 = arith.addf %58, %61 : vector<32x128xf32>
    %c127_i32_32 = arith.constant 127 : i32
    %63 = tpu.dynamic_rotate %50 by %c127_i32_32 dim 1 : vector<32x128xf32>, i32 -> vector<32x128xf32>
    %cst_33 = arith.constant 0.000000e+00 : f32
    %64 = vector.broadcast %cst_33 : f32 to vector<32x128xf32>
    %65 = arith.select %18, %63, %64 : vector<32x128xi1>, vector<32x128xf32>
    %66 = vector.extract_strided_slice %20 {offsets = [2, 0, 0], sizes = [1, 32, 32], strides = [1, 1, 1]} : vector<3x32x32xf32> to vector<1x32x32xf32>
    %67 = vector.shape_cast %66 : vector<1x32x32xf32> to vector<32x32xf32>
    %cst_34 = arith.constant dense<0.000000e+00> : vector<32x128xf32>
    %68 = tpu.matmul %67, %65, %cst_34 {dimension_numbers = #tpu.dot_dimension_numbers<[1], [0], [0], [1], [0, 0, 1, 1], [], []>} : vector<32x32xf32>, vector<32x128xf32>, vector<32x128xf32> -> vector<32x128xf32>
    %69 = arith.addf %62, %68 : vector<32x128xf32>
    %70 = vector.broadcast %22 : vector<32x1xf32> to vector<32x128xf32>
    %71 = arith.addf %69, %70 : vector<32x128xf32>
    %cst_35 = arith.constant dense<0.000000e+00> : vector<32xf32>
    %72 = vector.multi_reduction <add>, %71, %cst_35 [1] : vector<32x128xf32> to vector<32xf32>
    %73 = vector.shape_cast %72 : vector<32xf32> to vector<32x1xf32>
    %cst_36 = arith.constant 1.280000e+02 : f32
    %74 = vector.broadcast %cst_36 : f32 to vector<32x1xf32>
    %75 = arith.divf %73, %74 : vector<32x1xf32>
    %cst_37 = arith.constant dense<0xFF800000> : vector<32xf32>
    %76 = vector.multi_reduction <maximumf>, %71, %cst_37 [1] : vector<32x128xf32> to vector<32xf32>
    %77 = vector.shape_cast %76 : vector<32xf32> to vector<32x1xf32>
    %c0_i32_38 = arith.constant 0 : i32
    %78 = vector.broadcast %c0_i32_38 : i32 to vector<32x2xi32>
    %79 = arith.cmpi eq, %25, %78 : vector<32x2xi32>
    %80 = vector.shape_cast %75 : vector<32x1xf32> to vector<32x1xf32>
    %81 = vector.broadcast %80 : vector<32x1xf32> to vector<32x2xf32>
    %82 = vector.shape_cast %77 : vector<32x1xf32> to vector<32x1xf32>
    %83 = vector.broadcast %82 : vector<32x1xf32> to vector<32x2xf32>
    %84 = arith.select %79, %81, %83 : vector<32x2xi1>, vector<32x2xf32>
    %cst_39 = arith.constant dense<0.000000e+00> : vector<16x2xf32>
    %85 = tpu.matmul %23, %84, %cst_39 {dimension_numbers = #tpu.dot_dimension_numbers<[1], [0], [0], [1], [0, 0, 1, 1], [], []>} : vector<16x32xf32>, vector<32x2xf32>, vector<16x2xf32> -> vector<16x2xf32>
    %cst_40 = arith.constant 0.000000e+00 : f32
    %86 = vector.broadcast %cst_40 : f32 to vector<16x2xf32>
    %87 = arith.maximumf %85, %86 : vector<16x2xf32>
    %cst_41 = arith.constant dense<0.000000e+00> : vector<32x2xf32>
    %88 = tpu.matmul %24, %87, %cst_41 {dimension_numbers = #tpu.dot_dimension_numbers<[1], [0], [0], [1], [0, 0, 1, 1], [], []>} : vector<32x16xf32>, vector<16x2xf32>, vector<32x2xf32> -> vector<32x2xf32>
    %cst_42 = arith.constant dense<0.000000e+00> : vector<32xf32>
    %89 = vector.multi_reduction <add>, %88, %cst_42 [1] : vector<32x2xf32> to vector<32xf32>
    %90 = vector.shape_cast %89 : vector<32xf32> to vector<32x1xf32>
    %91 = arith.negf %90 : vector<32x1xf32>
    %92 = math.exp %91 : vector<32x1xf32>
    %cst_43 = arith.constant 1.000000e+00 : f32
    %93 = vector.broadcast %cst_43 : f32 to vector<32x1xf32>
    %94 = arith.addf %93, %92 : vector<32x1xf32>
    %95 = arith.divf %93, %94 : vector<32x1xf32>
    %96 = vector.broadcast %95 : vector<32x1xf32> to vector<32x128xf32>
    %97 = arith.mulf %71, %96 : vector<32x128xf32>
    %98 = arith.addf %97, %27 : vector<32x128xf32>
    %cst_44 = arith.constant 0.000000e+00 : f32
    %99 = vector.broadcast %cst_44 : f32 to vector<32x128xf32>
    %100 = arith.maximumf %98, %99 : vector<32x128xf32>
    %c0_45 = arith.constant 0 : index
    %c0_46 = arith.constant 0 : index
    %c0_47 = arith.constant 0 : index
    %101 = vector.load %arg8[%c0_45, %c0_46, %c0_47] : memref<2x32x128xf32, #tpu.memory_space<vmem>>, vector<1x32x128xf32>
    %102 = vector.shape_cast %101 : vector<1x32x128xf32> to vector<32x128xf32>
    %103 = vector.shape_cast %100 : vector<32x128xf32> to vector<1x32x128xf32>
    tpu.vector_store %arg8[%c0_45, %c0_46, %c0_47], %103 {strides = array<i32>} : memref<2x32x128xf32, #tpu.memory_space<vmem>>, vector<1x32x128xf32>,
    %c1 = arith.constant 1 : index
    %c0_48 = arith.constant 0 : index
    %c0_49 = arith.constant 0 : index
    %104 = vector.load %arg1[%c1, %c0_48, %c0_49] : memref<2x32x128xf32, #tpu.memory_space<vmem>>, vector<1x32x128xf32>
    %105 = vector.shape_cast %104 : vector<1x32x128xf32> to vector<32x128xf32>
    %cst_50 = arith.constant 0.000000e+00 : f32
    %106 = vector.broadcast %cst_50 : f32 to vector<32x128xf32>
    %c1_i32_51 = arith.constant 1 : i32
    %107 = tpu.dynamic_rotate %105 by %c1_i32_51 dim 1 : vector<32x128xf32>, i32 -> vector<32x128xf32>
    %cst_52 = arith.constant 0.000000e+00 : f32
    %108 = vector.broadcast %cst_52 : f32 to vector<32x128xf32>
    %109 = arith.select %9, %107, %108 : vector<32x128xi1>, vector<32x128xf32>
    %110 = vector.extract_strided_slice %19 {offsets = [0, 0, 0], sizes = [1, 32, 32], strides = [1, 1, 1]} : vector<3x32x32xf32> to vector<1x32x32xf32>
    %111 = vector.shape_cast %110 : vector<1x32x32xf32> to vector<32x32xf32>
    %cst_53 = arith.constant dense<0.000000e+00> : vector<32x128xf32>
    %112 = tpu.matmul %111, %109, %cst_53 {dimension_numbers = #tpu.dot_dimension_numbers<[1], [0], [0], [1], [0, 0, 1, 1], [], []>} : vector<32x32xf32>, vector<32x128xf32>, vector<32x128xf32> -> vector<32x128xf32>
    %113 = arith.addf %106, %112 : vector<32x128xf32>
    %114 = vector.extract_strided_slice %19 {offsets = [1, 0, 0], sizes = [1, 32, 32], strides = [1, 1, 1]} : vector<3x32x32xf32> to vector<1x32x32xf32>
    %115 = vector.shape_cast %114 : vector<1x32x32xf32> to vector<32x32xf32>
    %cst_54 = arith.constant dense<0.000000e+00> : vector<32x128xf32>
    %116 = tpu.matmul %115, %105, %cst_54 {dimension_numbers = #tpu.dot_dimension_numbers<[1], [0], [0], [1], [0, 0, 1, 1], [], []>} : vector<32x32xf32>, vector<32x128xf32>, vector<32x128xf32> -> vector<32x128xf32>
    %117 = arith.addf %113, %116 : vector<32x128xf32>
    %c127_i32_55 = arith.constant 127 : i32
    %118 = tpu.dynamic_rotate %105 by %c127_i32_55 dim 1 : vector<32x128xf32>, i32 -> vector<32x128xf32>
    %cst_56 = arith.constant 0.000000e+00 : f32
    %119 = vector.broadcast %cst_56 : f32 to vector<32x128xf32>
    %120 = arith.select %18, %118, %119 : vector<32x128xi1>, vector<32x128xf32>
    %121 = vector.extract_strided_slice %19 {offsets = [2, 0, 0], sizes = [1, 32, 32], strides = [1, 1, 1]} : vector<3x32x32xf32> to vector<1x32x32xf32>
    %122 = vector.shape_cast %121 : vector<1x32x32xf32> to vector<32x32xf32>
    %cst_57 = arith.constant dense<0.000000e+00> : vector<32x128xf32>
    %123 = tpu.matmul %122, %120, %cst_57 {dimension_numbers = #tpu.dot_dimension_numbers<[1], [0], [0], [1], [0, 0, 1, 1], [], []>} : vector<32x32xf32>, vector<32x128xf32>, vector<32x128xf32> -> vector<32x128xf32>
    %124 = arith.addf %117, %123 : vector<32x128xf32>
    %125 = vector.broadcast %21 : vector<32x1xf32> to vector<32x128xf32>
    %126 = arith.addf %124, %125 : vector<32x128xf32>
    %cst_58 = arith.constant 0.000000e+00 : f32
    %127 = vector.broadcast %cst_58 : f32 to vector<32x128xf32>
    %128 = arith.maximumf %126, %127 : vector<32x128xf32>
    %cst_59 = arith.constant 0.000000e+00 : f32
    %129 = vector.broadcast %cst_59 : f32 to vector<32x128xf32>
    %c1_i32_60 = arith.constant 1 : i32
    %130 = tpu.dynamic_rotate %128 by %c1_i32_60 dim 1 : vector<32x128xf32>, i32 -> vector<32x128xf32>
    %cst_61 = arith.constant 0.000000e+00 : f32
    %131 = vector.broadcast %cst_61 : f32 to vector<32x128xf32>
    %132 = arith.select %9, %130, %131 : vector<32x128xi1>, vector<32x128xf32>
    %133 = vector.extract_strided_slice %20 {offsets = [0, 0, 0], sizes = [1, 32, 32], strides = [1, 1, 1]} : vector<3x32x32xf32> to vector<1x32x32xf32>
    %134 = vector.shape_cast %133 : vector<1x32x32xf32> to vector<32x32xf32>
    %cst_62 = arith.constant dense<0.000000e+00> : vector<32x128xf32>
    %135 = tpu.matmul %134, %132, %cst_62 {dimension_numbers = #tpu.dot_dimension_numbers<[1], [0], [0], [1], [0, 0, 1, 1], [], []>} : vector<32x32xf32>, vector<32x128xf32>, vector<32x128xf32> -> vector<32x128xf32>
    %136 = arith.addf %129, %135 : vector<32x128xf32>
    %137 = vector.extract_strided_slice %20 {offsets = [1, 0, 0], sizes = [1, 32, 32], strides = [1, 1, 1]} : vector<3x32x32xf32> to vector<1x32x32xf32>
    %138 = vector.shape_cast %137 : vector<1x32x32xf32> to vector<32x32xf32>
    %cst_63 = arith.constant dense<0.000000e+00> : vector<32x128xf32>
    %139 = tpu.matmul %138, %128, %cst_63 {dimension_numbers = #tpu.dot_dimension_numbers<[1], [0], [0], [1], [0, 0, 1, 1], [], []>} : vector<32x32xf32>, vector<32x128xf32>, vector<32x128xf32> -> vector<32x128xf32>
    %140 = arith.addf %136, %139 : vector<32x128xf32>
    %c127_i32_64 = arith.constant 127 : i32
    %141 = tpu.dynamic_rotate %128 by %c127_i32_64 dim 1 : vector<32x128xf32>, i32 -> vector<32x128xf32>
    %cst_65 = arith.constant 0.000000e+00 : f32
    %142 = vector.broadcast %cst_65 : f32 to vector<32x128xf32>
    %143 = arith.select %18, %141, %142 : vector<32x128xi1>, vector<32x128xf32>
    %144 = vector.extract_strided_slice %20 {offsets = [2, 0, 0], sizes = [1, 32, 32], strides = [1, 1, 1]} : vector<3x32x32xf32> to vector<1x32x32xf32>
    %145 = vector.shape_cast %144 : vector<1x32x32xf32> to vector<32x32xf32>
    %cst_66 = arith.constant dense<0.000000e+00> : vector<32x128xf32>
    %146 = tpu.matmul %145, %143, %cst_66 {dimension_numbers = #tpu.dot_dimension_numbers<[1], [0], [0], [1], [0, 0, 1, 1], [], []>} : vector<32x32xf32>, vector<32x128xf32>, vector<32x128xf32> -> vector<32x128xf32>
    %147 = arith.addf %140, %146 : vector<32x128xf32>
    %148 = vector.broadcast %22 : vector<32x1xf32> to vector<32x128xf32>
    %149 = arith.addf %147, %148 : vector<32x128xf32>
    %cst_67 = arith.constant dense<0.000000e+00> : vector<32xf32>
    %150 = vector.multi_reduction <add>, %149, %cst_67 [1] : vector<32x128xf32> to vector<32xf32>
    %151 = vector.shape_cast %150 : vector<32xf32> to vector<32x1xf32>
    %cst_68 = arith.constant 1.280000e+02 : f32
    %152 = vector.broadcast %cst_68 : f32 to vector<32x1xf32>
    %153 = arith.divf %151, %152 : vector<32x1xf32>
    %cst_69 = arith.constant dense<0xFF800000> : vector<32xf32>
    %154 = vector.multi_reduction <maximumf>, %149, %cst_69 [1] : vector<32x128xf32> to vector<32xf32>
    %155 = vector.shape_cast %154 : vector<32xf32> to vector<32x1xf32>
    %c0_i32_70 = arith.constant 0 : i32
    %156 = vector.broadcast %c0_i32_70 : i32 to vector<32x2xi32>
    %157 = arith.cmpi eq, %25, %156 : vector<32x2xi32>
    %158 = vector.shape_cast %153 : vector<32x1xf32> to vector<32x1xf32>
    %159 = vector.broadcast %158 : vector<32x1xf32> to vector<32x2xf32>
    %160 = vector.shape_cast %155 : vector<32x1xf32> to vector<32x1xf32>
    %161 = vector.broadcast %160 : vector<32x1xf32> to vector<32x2xf32>
    %162 = arith.select %157, %159, %161 : vector<32x2xi1>, vector<32x2xf32>
    %cst_71 = arith.constant dense<0.000000e+00> : vector<16x2xf32>
    %163 = tpu.matmul %23, %162, %cst_71 {dimension_numbers = #tpu.dot_dimension_numbers<[1], [0], [0], [1], [0, 0, 1, 1], [], []>} : vector<16x32xf32>, vector<32x2xf32>, vector<16x2xf32> -> vector<16x2xf32>
    %cst_72 = arith.constant 0.000000e+00 : f32
    %164 = vector.broadcast %cst_72 : f32 to vector<16x2xf32>
    %165 = arith.maximumf %163, %164 : vector<16x2xf32>
    %cst_73 = arith.constant dense<0.000000e+00> : vector<32x2xf32>
    %166 = tpu.matmul %24, %165, %cst_73 {dimension_numbers = #tpu.dot_dimension_numbers<[1], [0], [0], [1], [0, 0, 1, 1], [], []>} : vector<32x16xf32>, vector<16x2xf32>, vector<32x2xf32> -> vector<32x2xf32>
    %cst_74 = arith.constant dense<0.000000e+00> : vector<32xf32>
    %167 = vector.multi_reduction <add>, %166, %cst_74 [1] : vector<32x2xf32> to vector<32xf32>
    %168 = vector.shape_cast %167 : vector<32xf32> to vector<32x1xf32>
    %169 = arith.negf %168 : vector<32x1xf32>
    %170 = math.exp %169 : vector<32x1xf32>
    %cst_75 = arith.constant 1.000000e+00 : f32
    %171 = vector.broadcast %cst_75 : f32 to vector<32x1xf32>
    %172 = arith.addf %171, %170 : vector<32x1xf32>
    %173 = arith.divf %171, %172 : vector<32x1xf32>
    %174 = vector.broadcast %173 : vector<32x1xf32> to vector<32x128xf32>
    %175 = arith.mulf %149, %174 : vector<32x128xf32>
    %176 = arith.addf %175, %105 : vector<32x128xf32>
    %cst_76 = arith.constant 0.000000e+00 : f32
    %177 = vector.broadcast %cst_76 : f32 to vector<32x128xf32>
    %178 = arith.maximumf %176, %177 : vector<32x128xf32>
    %c1_77 = arith.constant 1 : index
    %c0_78 = arith.constant 0 : index
    %c0_79 = arith.constant 0 : index
    %179 = vector.load %arg8[%c1_77, %c0_78, %c0_79] : memref<2x32x128xf32, #tpu.memory_space<vmem>>, vector<1x32x128xf32>
    %180 = vector.shape_cast %179 : vector<1x32x128xf32> to vector<32x128xf32>
    %181 = vector.shape_cast %178 : vector<32x128xf32> to vector<1x32x128xf32>
    tpu.vector_store %arg8[%c1_77, %c0_78, %c0_79], %181 {strides = array<i32>} : memref<2x32x128xf32, #tpu.memory_space<vmem>>, vector<1x32x128xf32>,
    return
  }
  func.func @transform_0(%arg0: i32) -> (i32, i32, i32) {
    %c0_i32 = arith.constant 0 : i32
    %c0_i32_0 = arith.constant 0 : i32
    %c0_i32_1 = arith.constant 0 : i32
    return %arg0, %c0_i32, %c0_i32_0 : i32, i32, i32
  }
  func.func @transform_1(%arg0: i32) -> (i32, i32, i32) {
    %c0_i32 = arith.constant 0 : i32
    %c0_i32_0 = arith.constant 0 : i32
    %c0_i32_1 = arith.constant 0 : i32
    %c0_i32_2 = arith.constant 0 : i32
    return %c0_i32, %c0_i32_0, %c0_i32_1 : i32, i32, i32
  }
  func.func @transform_2(%arg0: i32) -> (i32, i32) {
    %c0_i32 = arith.constant 0 : i32
    %c0_i32_0 = arith.constant 0 : i32
    %c0_i32_1 = arith.constant 0 : i32
    return %c0_i32, %c0_i32_0 : i32, i32
  }
  func.func @transform_3(%arg0: i32) -> (i32, i32, i32) {
    %c0_i32 = arith.constant 0 : i32
    %c0_i32_0 = arith.constant 0 : i32
    %c0_i32_1 = arith.constant 0 : i32
    %c0_i32_2 = arith.constant 0 : i32
    return %c0_i32, %c0_i32_0, %c0_i32_1 : i32, i32, i32
  }
  func.func @transform_4(%arg0: i32) -> (i32, i32) {
    %c0_i32 = arith.constant 0 : i32
    %c0_i32_0 = arith.constant 0 : i32
    %c0_i32_1 = arith.constant 0 : i32
    return %c0_i32, %c0_i32_0 : i32, i32
  }
  func.func @transform_5(%arg0: i32) -> (i32, i32) {
    %c0_i32 = arith.constant 0 : i32
    %c0_i32_0 = arith.constant 0 : i32
    %c0_i32_1 = arith.constant 0 : i32
    return %c0_i32, %c0_i32_0 : i32, i32
  }
  func.func @transform_6(%arg0: i32) -> (i32, i32) {
    %c0_i32 = arith.constant 0 : i32
    %c0_i32_0 = arith.constant 0 : i32
    %c0_i32_1 = arith.constant 0 : i32
    return %c0_i32, %c0_i32_0 : i32, i32
  }
  func.func @transform_7(%arg0: i32) -> (i32, i32, i32) {
    %c0_i32 = arith.constant 0 : i32
    %c0_i32_0 = arith.constant 0 : i32
    %c0_i32_1 = arith.constant 0 : i32
    return %arg0, %c0_i32, %c0_i32_0 : i32, i32, i32
  }
}

</mosaic_0001>

<bundles_post_ra>
// kernel: tpu_custom_call.1
= control target key start
LH: loop header
LB: loop body
LE: loop exit
PB: predicated region body
PF: predicated region fallthrough
CT: control target
= control target key end

     0   :  { %12 = vsyncpa [#allocation3], 0  ;;  %s1941_s0 = inlined_call_operand.vmem [shape: f32[2,32,128], index: 0, kind: input, shape index: {}]   ;;  %s1942_s1 = inlined_call_operand.hbm [shape: f32[3,32,32], index: 1, kind: input, shape index: {}]   ;;  %s1943_s2 = inlined_call_operand.vmem [shape: f32[32,1], index: 2, kind: input, shape index: {}]   ;;  %s1944_s3 = inlined_call_operand.hbm [shape: f32[3,32,32], index: 3, kind: input, shape index: {}]   ;;  %s1945_s4 = inlined_call_operand.vmem [shape: f32[32,1], index: 4, kind: input, shape index: {}]   ;;  %s1946_s5 = inlined_call_operand.vmem [shape: f32[16,32], index: 5, kind: input, shape index: {}]   ;;  %s1947_s6 = inlined_call_operand.vmem [shape: f32[32,16], index: 6, kind: input, shape index: {}]   ;;  %s1948_s7 = inlined_call_operand.hbm [shape: f32[2,32,128], index: 7, kind: output, shape index: {}]  }
   0x1   :  { %13 = vsyncpa [#allocation6], 0 }
   0x2   :  { %14 = vsyncpa [#allocation4], 0  ;;  %s21_s26 = sshll.u32 %s1942_s1, 4  ;;  %s1364_s27 = smov [#allocation2]   ;;  %s22_s26 = int_to_ptr.hbm [resolvable:$true] %s21_s26 }
   0x3   :  { %s23_s28 = sshll.u32 %s1364_s27, 4  ;;  %s36_s8 = sshll.u32 %s1944_s3, 4  ;;  %s24_s28 = int_to_ptr.vmem [resolvable:$true] %s23_s28  ;;  %s37_s8 = int_to_ptr.hbm [resolvable:$true] %s36_s8 }
   0x4   :  { %s1365_s9 = smov 128   ;;  %s1366_s10 = smov 8  }
   0x5   :  { %29 = dma.hbm_to_vmem [thread:$0]  %s22_s26, 1536, %s24_s28, [#allocation3], %s1365_s9, %s1365_s9, %s1366_s10  }
   0x6   :  { %s1367_s11 = smov [#allocation5]  }
   0x7   :  { %s38_s12 = sshll.u32 %s1367_s11, 4  ;;  %s39_s12 = int_to_ptr.vmem [resolvable:$true] %s38_s12 }
   0x8   :  { %44 = dma.hbm_to_vmem [thread:$0]  %s37_s8, 1536, %s39_s12, [#allocation6], %s1365_s9, %s1365_s9, %s1366_s10  }
   0x9   :  { %1358 = dma.done.wait [#allocation3], 1536  }
   0xa   :  { %1359 = vsyncadd [#allocation3], 4294965760 }
   0xb   :  { %1360 = dma.done.wait [#allocation6], 1536  }
   0xc   :  { %1361 = vsyncadd [#allocation6], 4294965760  ;;  %v110_v0 = vld [vmem:[%s1941_s0 + $0x18] sm:$0xff]  ;;  %s1368_s13 = smov 127   ;;  %s1369_s14 = smov 1   ;;  %v1433_v1 = vld [vmem:[%s1941_s0 + $0x10] sm:$0xff]  ;;  %v59_v5 = vlaneseq }
   0xd   :  { %212 = vrot.lane.b32.xlu0 %v110_v0, %s1368_s13  ;;  %117 = vrot.lane.b32.xlu1 %v110_v0, %s1369_s14  ;;  %v108_v2 = vld [vmem:[%s1941_s0 + $0x8] sm:$0xff]  ;;  %v1445_v3 = vld [vmem:[%s1941_s0] sm:$0xff]  ;;  %v1457_v4 = vld [vmem:[#allocation2 + $0x38] sm:$0xff]  ;;  %vm123_vm0 = vcmask 261120   ;;  %v1370_v16 = vmov 0   ;;  %vm529_vm5 = vcmask 130048  }
   0xe   :  { %115 = vrot.lane.b32.xlu2 %v1433_v1, %s1369_s14  ;;  %1230 = vmatpush.msra.mxu1 %v110_v0  ;;  %v1461_v6 = vld [vmem:[#allocation2 + $0x20] sm:$0xff]  ;;  %v1465_v7 = vand.u32 127, %v59_v5  ;;  %v1467_v8 = vld [vmem:[#allocation2 + $0x28] sm:$0xff]  ;;  %v1483_v14 = vld [vmem:[#allocation2 + $0x30] sm:$0xff]  ;;  %vm571_vm6 = vcmask 15360  }
   0xf   :  { %148 = vmatpush.msra.mxu0 %v110_v0  ;;  %v94_v15 = vld [vmem:[%s1943_s2 + $0x8] sm:$0xff]  ;;  %1249 = vset.pattern.permute.xlu1 %v1370_v16  ;;  %v1496_v20 = vld [vmem:[#allocation2 + $0x40] sm:$0xff]  ;;  %v96_v21 = vld [vmem:[%s1943_s2 + $0x18] sm:$0xff] }
  0x10   :  { %1231 = vmatpush.msra.mxu1 %v1433_v1  ;;  %v1470_v9 = vadd.s32 1, %v1465_v7  ;;  %v1473_v10 = vadd.s32 4294967295, %v1465_v7  ;;  %1248 = vset.pattern.permute.xlu0 %v1370_v16  ;;  %v95_v22 = vld [vmem:[%s1943_s2 + $0x10] sm:$0xff]  ;;  %v1510_v25 = vld [vmem:[#allocation2] sm:$0xff]  ;;  %v1517_v27 = vld [vmem:[#allocation2 + $0x48] sm:$0xff]  ;;  %vm493_vm4 = vcmp.eq.s32.totalorder %v1465_v7, 0 }
  0x11   :  { %149 = vmatpush.msra.mxu0 %v1433_v1  ;;  %1247 = vset.pattern.permute.xlu2 %v1370_v16  ;;  %v93_v26 = vld [vmem:[%s1943_s2] sm:$0xff]  ;;  %v1523_v28 = vld [vmem:[#allocation2 + $0x8] sm:$0xff]  ;;  %v1525_v29 = vld [vmem:[#allocation2 + $0x50] sm:$0xff] }
  0x12   :  { %1232 = vmatpush.msra.mxu1 %v108_v2  ;;  %vm67_vm1 = vcmp.lt.s32.totalorder %v1470_v9, 128  ;;  %vm62_vm2 = vcmp.ge.s32.totalorder %v1473_v10, 0  ;;  %v1531_v30 = vld [vmem:[#allocation2 + $0x10] sm:$0xff]  ;;  %v1533_v31 = vld [vmem:[#allocation2 + $0x58] sm:$0xff]  ;;  %v98_v5 = vld [vmem:[%s1945_s4 + $0x8] sm:$0xff] }
  0x13   :  { %150 = vmatpush.msra.mxu0 %v108_v2  ;;  %v1539_v32 = vld [vmem:[#allocation2 + $0x18] sm:$0xff]  ;;  %v1583_v16 = vld [vmem:[#allocation5 + $0x30] sm:$0xff] }
  0x14   :  { %1233 = vmatpush.msra.mxu1 %v1445_v3 }
  0x15   :  { %210 = vrot.lane.b32.xlu0 %v1433_v1, %s1368_s13  ;;  %208 = vrot.lane.b32.xlu1 %v108_v2, %s1368_s13 }
  0x16   :  { %206 = vrot.lane.b32.xlu2 %v1445_v3, %s1368_s13  ;;  %151 = vmatpush.msra.mxu0 %v1445_v3 }
  0x17   :  { %1129 = vmatmul.msk.f32.vlgmr.msra.gmra.mxu1 %vm123_vm0, %v1457_v4  ;;  %1126 = vmatmul.msk.f32.vlgmr.msra.gmra.mxu0 %vm123_vm0, %v1461_v6 }
  0x1d   :  { %113 = vrot.lane.b32.xlu0 %v108_v2, %s1369_s14  ;;  %111 = vrot.lane.b32.xlu1 %v1445_v3, %s1369_s14  ;;  %v100_v2 = vld [vmem:[%s1945_s4 + $0x18] sm:$0xff] }
  0x1e   :  { %280 = vperm.xlu2 %1247, %v96_v21  }
  0x1f   :  { %1127 = vmatmul.msk.f32.gmra.mxu0 %vm123_vm0, %v1467_v8 }
  0x25   :  { %270 = vperm.xlu1 %1249, %v94_v15   ;;  %275 = vperm.xlu0 %1248, %v95_v22   ;;  %v1579_v15 = vld [vmem:[#allocation5 + $0x28] sm:$0xff] }
  0x26   :  { %265 = vperm.xlu2 %1247, %v93_v26   ;;  %v1607_v26 = vld [vmem:[%s1941_s0 + $0x30] sm:$0xff] }
  0x27   :  { %1128 = vmatmul.msk.f32.gmra.mxu0 %vm123_vm0, %v1483_v14 }
  0x68   :  { %v116_v11 = vpop.permute.xlu2 %115 }
  0x70   :  { %v207_v19 = vpop.permute.xlu2 %206 }
  0x78   :  { %v1549_v51 = vpop.permute.xlu2 %280 }
  0x7f   :  { %v213_v12 = vpop.permute.xlu0 %212  ;;  %v118_v13 = vpop.permute.xlu1 %117 }
  0x80   :  { %1138 = vmatpush.msk.msra.mxu2 %vm67_vm1, %v213_v12  ;;  %1130 = vmatpush.msk.msrb.mxu1 %vm62_vm2, %v118_v13  ;;  %v1554_v61 = vpop.permute.xlu2 %265  ;;  %v97_v12 = vld [vmem:[%s1945_s4] sm:$0xff] }
  0x81   :  { %v1575_v13 = vld [vmem:[#allocation5 + $0x20] sm:$0xff] }
  0x82   :  { %1131 = vmatpush.msk.msrb.mxu1 %vm62_vm2, %v116_v11  ;;  %v99_v11 = vld [vmem:[%s1945_s4 + $0x10] sm:$0xff]  ;;  %s1112_s4 = sshll.u32 %s1948_s7, 4  ;;  %s1113_s4 = int_to_ptr.hbm [resolvable:$true] %s1112_s4 }
  0x87   :  { %v211_v17 = vpop.permute.xlu0 %210  ;;  %v209_v18 = vpop.permute.xlu1 %208 }
  0x88   :  { %1139 = vmatpush.msk.msra.mxu2 %vm67_vm1, %v211_v17 }
  0x8a   :  { %1140 = vmatpush.msk.msra.mxu2 %vm67_vm1, %v209_v18 }
  0x8c   :  { %1141 = vmatpush.msk.msra.mxu2 %vm67_vm1, %v207_v19  ;;  %v1587_v19 = vld [vmem:[#allocation5 + $0x38] sm:$0xff] }
  0x8d   :  { %1142 = vmatmul.msk.f32.vlgmr.msra.gmra.mxu2 %vm123_vm0, %v1496_v20 }
  0x8f   :  { %v114_v23 = vpop.permute.xlu0 %113  ;;  %v112_v24 = vpop.permute.xlu1 %111 }
  0x90   :  { %1132 = vmatpush.msk.msrb.mxu1 %vm62_vm2, %v114_v23 }
  0x92   :  { %1133 = vmatpush.msk.msrb.mxu1 %vm62_vm2, %v112_v24  ;;  %v1602_v24 = vld [vmem:[%s1941_s0 + $0x38] sm:$0xff] }
  0x93   :  { %1134 = vmatmul.msk.f32.vlgmr.msrb.gmra.mxu1 %vm123_vm0, %v1510_v25 }
  0x94   :  { %v162_v33 = vpop.f32.mrf.mxu1  ;;  %v153_v34 = vpop.f32.mrf.mxu0 }
  0x95   :  { %1143 = vmatmul.msk.f32.gmra.mxu2 %vm123_vm0, %v1517_v27 }
  0x97   :  { %v1543_v41 = vpop.permute.xlu1 %270  ;;  %v1547_v49 = vpop.permute.xlu0 %275 }
  0x9b   :  { %1135 = vmatmul.msk.f32.gmra.mxu1 %vm123_vm0, %v1523_v28 }
  0x9c   :  { %v156_v37 = vpop.f32.mrf.mxu0 }
  0x9d   :  { %1144 = vmatmul.msk.f32.gmra.mxu2 %vm123_vm0, %v1525_v29 }
  0xa3   :  { %1136 = vmatmul.msk.f32.gmra.mxu1 %vm123_vm0, %v1531_v30 }
  0xa4   :  { %v159_v44 = vpop.f32.mrf.mxu0 }
  0xa5   :  { %1145 = vmatmul.msk.f32.gmra.mxu2 %vm123_vm0, %v1533_v31 }
  0xab   :  { %1137 = vmatmul.msk.f32.gmra.mxu1 %vm123_vm0, %v1539_v32 }
 0x110   :  { %v194_v35 = vpop.f32.mrf.mxu1  ;;  %v247_v36 = vpop.f32.mrf.mxu2 }
 0x111   :  { %v195_v56 = vadd.f32 %v194_v35, %v153_v34 }
 0x113   :  { %v259_v59 = vadd.f32 %v247_v36, %v195_v56  ;;  %v1625_v36 = vld [vmem:[#allocation5 + $0x40] sm:$0xff] }
 0x115   :  { %v283_v63 = vadd.f32 %v1554_v61, %v259_v59 }
 0x117   :  { %v287_v0 = vmax.f32 %v283_v63, 0.0 }
 0x118   :  { %v197_v38 = vpop.f32.mrf.mxu1  ;;  %v250_v39 = vpop.f32.mrf.mxu2 }
 0x119   :  { %v198_v40 = vadd.f32 %v197_v38, %v156_v37  ;;  %v1632_v38 = vld [vmem:[%s1941_s0 + $0x28] sm:$0xff] }
 0x11b   :  { %v260_v42 = vadd.f32 %v250_v39, %v198_v40  ;;  %v1636_v39 = vld [vmem:[#allocation5 + $0x8] sm:$0xff] }
 0x11c   :  { %v1644_v40 = vld [vmem:[#allocation5 + $0x48] sm:$0xff] }
 0x11d   :  { %v284_v43 = vadd.f32 %v1543_v41, %v260_v42  ;;  %v1648_v42 = vld [vmem:[#allocation5 + $0x10] sm:$0xff] }
 0x11f   :  { %v288_v45 = vmax.f32 %v284_v43, 0.0  ;;  %v1652_v43 = vld [vmem:[#allocation5 + $0x50] sm:$0xff] }
 0x120   :  { %v200_v46 = vpop.f32.mrf.mxu1  ;;  %v253_v47 = vpop.f32.mrf.mxu2 }
 0x121   :  { %v201_v48 = vadd.f32 %v200_v46, %v159_v44  ;;  %293 = vrot.lane.b32.xlu1 %v288_v45, %s1369_s14  ;;  %v1656_v44 = vld [vmem:[#allocation5 + $0x18] sm:$0xff] }
 0x123   :  { %v261_v50 = vadd.f32 %v253_v47, %v201_v48 }
 0x125   :  { %v285_v52 = vadd.f32 %v1547_v49, %v261_v50 }
 0x127   :  { %v289_v53 = vmax.f32 %v285_v52, 0.0 }
 0x128   :  { %v203_v54 = vpop.f32.mrf.mxu1  ;;  %v256_v55 = vpop.f32.mrf.mxu2 }
 0x129   :  { %v204_v57 = vadd.f32 %v203_v54, %v162_v33  ;;  %295 = vrot.lane.b32.xlu2 %v289_v53, %s1369_s14  ;;  %v1611_v33 = vld [vmem:[#allocation5] sm:$0xff] }
 0x12b   :  { %v262_v58 = vadd.f32 %v256_v55, %v204_v57 }
 0x12d   :  { %v286_v60 = vadd.f32 %v1549_v51, %v262_v58 }
 0x12f   :  { %v290_v62 = vmax.f32 %v286_v60, 0.0 }
 0x131   :  { %391 = vrot.lane.b32.xlu0 %v290_v62, %s1368_s13  ;;  %327 = vmatpush.msrb.mxu2 %v290_v62 }
 0x132   :  { %1234 = vmatpush.msra.mxu3 %v290_v62  ;;  %389 = vrot.lane.b32.xlu2 %v289_v53, %s1368_s13 }
 0x133   :  { %297 = vrot.lane.b32.xlu1 %v290_v62, %s1369_s14  ;;  %328 = vmatpush.msrb.mxu2 %v289_v53 }
 0x134   :  { %1235 = vmatpush.msra.mxu3 %v289_v53 }
 0x135   :  { %329 = vmatpush.msrb.mxu2 %v288_v45 }
 0x136   :  { %1236 = vmatpush.msra.mxu3 %v288_v45 }
 0x137   :  { %330 = vmatpush.msrb.mxu2 %v287_v0 }
 0x138   :  { %1237 = vmatpush.msra.mxu3 %v287_v0  ;;  %1146 = vmatmul.msk.f32.vlgmr.msrb.gmra.mxu2 %vm123_vm0, %v1575_v13 }
 0x139   :  { %291 = vrot.lane.b32.xlu0 %v287_v0, %s1369_s14  ;;  %1147 = vmatmul.msk.f32.vlgmr.msra.gmra.mxu3 %vm123_vm0, %v1579_v15 }
 0x13a   :  { %385 = vrot.lane.b32.xlu2 %v287_v0, %s1368_s13 }
 0x13b   :  { %387 = vrot.lane.b32.xlu1 %v288_v45, %s1368_s13  ;;  %v1660_v45 = vld [vmem:[#allocation5 + $0x58] sm:$0xff] }
 0x141   :  { %459 = vperm.xlu0 %1248, %v100_v2   ;;  %1148 = vmatmul.msk.f32.gmra.mxu3 %vm123_vm0, %v1583_v16 }
 0x142   :  { %449 = vperm.xlu2 %1247, %v98_v5  }
 0x143   :  { %454 = vperm.xlu1 %1249, %v99_v11  }
 0x149   :  { %444 = vperm.xlu0 %1248, %v97_v12   ;;  %1149 = vmatmul.msk.f32.gmra.mxu3 %vm123_vm0, %v1587_v19 }
 0x14a   :  { %687 = vrot.lane.b32.xlu2 %v1602_v24, %s1369_s14 }
 0x14b   :  { %757 = vrot.lane.b32.xlu1 %v1602_v24, %s1368_s13 }
 0x151   :  { %685 = vrot.lane.b32.xlu0 %v1607_v26, %s1369_s14 }
 0x152   :  { %755 = vrot.lane.b32.xlu2 %v1607_v26, %s1368_s13 }
 0x159   :  { %683 = vrot.lane.b32.xlu0 %v1632_v38, %s1369_s14 }
 0x183   :  { %v296_v17 = vpop.permute.xlu2 %295 }
 0x18c   :  { %v390_v22 = vpop.permute.xlu2 %389 }
 0x193   :  { %v294_v18 = vpop.permute.xlu1 %293 }
 0x194   :  { %v386_v37 = vpop.permute.xlu2 %385 }
 0x19c   :  { %v1664_v46 = vpop.permute.xlu2 %449 }
 0x1a3   :  { %v392_v21 = vpop.permute.xlu0 %391 }
 0x1a4   :  { %1158 = vmatpush.msk.msra.mxu1 %vm67_vm1, %v392_v21  ;;  %v688_v53 = vpop.permute.xlu2 %687 }
 0x1a5   :  { %v298_v23 = vpop.permute.xlu1 %297 }
 0x1a6   :  { %1150 = vmatpush.msk.msrb.mxu0 %vm62_vm2, %v298_v23  ;;  %1159 = vmatpush.msk.msra.mxu1 %vm67_vm1, %v390_v22 }
 0x1a8   :  { %1151 = vmatpush.msk.msrb.mxu0 %vm62_vm2, %v296_v17 }
 0x1aa   :  { %1152 = vmatpush.msk.msrb.mxu0 %vm62_vm2, %v294_v18 }
 0x1ab   :  { %v292_v34 = vpop.permute.xlu0 %291 }
 0x1ac   :  { %1153 = vmatpush.msk.msrb.mxu0 %vm62_vm2, %v292_v34 }
 0x1ad   :  { %v388_v35 = vpop.permute.xlu1 %387  ;;  %1154 = vmatmul.msk.f32.vlgmr.msrb.gmra.mxu0 %vm123_vm0, %v1611_v33 }
 0x1ae   :  { %1160 = vmatpush.msk.msra.mxu1 %vm67_vm1, %v388_v35  ;;  %1184 = vmatpush.msk.msra.mxu0 %vm62_vm2, %v688_v53 }
 0x1b0   :  { %1161 = vmatpush.msk.msra.mxu1 %vm67_vm1, %v386_v37  ;;  %v756_v37 = vpop.permute.xlu2 %755 }
 0x1b1   :  { %1162 = vmatmul.msk.f32.vlgmr.msra.gmra.mxu1 %vm123_vm0, %v1625_v36 }
 0x1b3   :  { %v1666_v47 = vpop.permute.xlu0 %459 }
 0x1b5   :  { %1155 = vmatmul.msk.f32.gmra.mxu0 %vm123_vm0, %v1636_v39  ;;  %v1682_v12 = vpop.permute.xlu1 %454 }
 0x1b9   :  { %1163 = vmatmul.msk.f32.gmra.mxu1 %vm123_vm0, %v1644_v40 }
 0x1bb   :  { %v332_v48 = vpop.f32.mrf.mxu2  ;;  %v1670_v57 = vpop.permute.xlu0 %444 }
 0x1bc   :  { %v335_v54 = vpop.f32.mrf.mxu3 }
 0x1bd   :  { %1156 = vmatmul.msk.f32.gmra.mxu0 %vm123_vm0, %v1648_v42  ;;  %v758_v35 = vpop.permute.xlu1 %757 }
 0x1be   :  { %1192 = vmatpush.msk.msrb.mxu1 %vm67_vm1, %v758_v35 }
 0x1c0   :  { %1193 = vmatpush.msk.msrb.mxu1 %vm67_vm1, %v756_v37 }
 0x1c1   :  { %1164 = vmatmul.msk.f32.gmra.mxu1 %vm123_vm0, %v1652_v43 }
 0x1c4   :  { %v338_v63 = vpop.f32.mrf.mxu3 }
 0x1c5   :  { %1157 = vmatmul.msk.f32.gmra.mxu0 %vm123_vm0, %v1656_v44 }
 0x1c9   :  { %1165 = vmatmul.msk.f32.gmra.mxu1 %vm123_vm0, %v1660_v45 }
 0x1cc   :  { %v341_v21 = vpop.f32.mrf.mxu3 }
 0x22a   :  { %v373_v50 = vpop.f32.mrf.mxu0 }
 0x22b   :  { %v374_v52 = vadd.f32 %v373_v50, %v332_v48  ;;  %v686_v48 = vpop.permute.xlu0 %685 }
 0x22c   :  { %1185 = vmatpush.msk.msra.mxu0 %vm62_vm2, %v686_v48 }
 0x22e   :  { %v426_v55 = vpop.f32.mrf.mxu1 }
 0x22f   :  { %v438_v56 = vadd.f32 %v426_v55, %v374_v52  ;;  %v1705_v55 = vld [vmem:[%s1941_s0 + $0x20] sm:$0xff] }
 0x231   :  { %v1673_v58 = vadd.f32 %v1670_v57, %v438_v56  ;;  %v1371_v56 = vmov 128.0  }
 0x232   :  { %v376_v59 = vpop.f32.mrf.mxu0  ;;  %1250 = vrcp.f32 %v1371_v56 }
 0x233   :  { %485 = vmax.xlane.f32.xlu1 %v1673_v58  ;;  %466 = vadd.xlane.f32.xlu2 %v1673_v58  ;;  %v377_v60 = vadd.f32 %v376_v59, %v335_v54  ;;  %v684_v54 = vpop.permute.xlu0 %683 }
 0x234   :  { %1186 = vmatpush.msk.msra.mxu0 %vm62_vm2, %v684_v54 }
 0x236   :  { %v429_v62 = vpop.f32.mrf.mxu1 }
 0x237   :  { %v439_v0 = vadd.f32 %v429_v62, %v377_v60 }
 0x238   :  { %v1251_v60 = vpop.eup %1250 }
 0x239   :  { %v1678_v2 = vadd.f32 %v1664_v46, %v439_v0  ;;  %vm479_vm3 = vweird.f32 %v1251_v60 }
 0x23a   :  { %v379_v5 = vpop.f32.mrf.mxu0 }
 0x23b   :  { %487 = vmax.xlane.f32.xlu0 %v1678_v2  ;;  %468 = vadd.xlane.f32.xlu2 %v1678_v2  ;;  %v380_v11 = vadd.f32 %v379_v5, %v338_v63  ;;  %v475_v63 = vmul.f32 128.0, %v1251_v60 }
 0x23d   :  { %v476_v0 = vsub.f32 1.0, %v475_v63 }
 0x23e   :  { %v432_v17 = vpop.f32.mrf.mxu1 }
 0x23f   :  { %v440_v18 = vadd.f32 %v432_v17, %v380_v11  ;;  %v477_v11 = vmul.f32 %v1251_v60, %v476_v0  ;;  %v1729_v0 = vld [vmem:[%s1946_s5] sm:$0xff] }
 0x241   :  { %v1685_v22 = vadd.f32 %v1682_v12, %v440_v18 }
 0x242   :  { %v382_v23 = vpop.f32.mrf.mxu0 }
 0x243   :  { %489 = vmax.xlane.f32.xlu1 %v1685_v22  ;;  %470 = vadd.xlane.f32.xlu2 %v1685_v22  ;;  %v383_v34 = vadd.f32 %v382_v23, %v341_v21  ;;  %v478_v21 = vadd.f32 %v1251_v60, %v477_v11 }
 0x246   :  { %v435_v50 = vpop.f32.mrf.mxu1 }
 0x247   :  { %v441_v52 = vadd.f32 %v435_v50, %v383_v34  ;;  %v1713_v34 = vsel %vm479_vm3, %v1251_v60, %v478_v21 }
 0x249   :  { %v1696_v53 = vadd.f32 %v1666_v47, %v441_v52 }
 0x24b   :  { %491 = vmax.xlane.f32.xlu0 %v1696_v53  ;;  %472 = vadd.xlane.f32.xlu1 %v1696_v53 }
 0x25b   :  { %751 = vrot.lane.b32.xlu2 %v1705_v55, %s1368_s13 }
 0x25f   :  { %753 = vrot.lane.b32.xlu0 %v1632_v38, %s1368_s13 }
 0x264   :  { %681 = vrot.lane.b32.xlu1 %v1705_v55, %s1369_s14 }
 0x2a6   :  { %v467_v59 = vpop.xlane.xlu2 %466  ;;  %v486_v62 = vpop.xlane.xlu1 %485 }
 0x2a7   :  { %v481_v56 = vmul.f32 %v1713_v34, %v467_v59  ;;  %v1740_v59 = vld [vmem:[%s1946_s5 + $0x8] sm:$0xff] }
 0x2ae   :  { %v469_v5 = vpop.xlane.xlu2 %468  ;;  %v488_v18 = vpop.xlane.xlu0 %487 }
 0x2af   :  { %v482_v52 = vmul.f32 %v1713_v34, %v469_v5  ;;  %v494_v5 = vsel %vm493_vm4, %v481_v56, %v486_v62 }
 0x2b1   :  { %v495_v63 = vsel %vm493_vm4, %v482_v52, %v488_v18 }
 0x2b6   :  { %v490_v17 = vpop.xlane.xlu1 %489  ;;  %v471_v23 = vpop.xlane.xlu2 %470 }
 0x2b7   :  { %v483_v37 = vmul.f32 %v1713_v34, %v471_v23 }
 0x2b9   :  { %v496_v60 = vsel %vm493_vm4, %v483_v37, %v490_v17 }
 0x2be   :  { %v473_v35 = vpop.xlane.xlu1 %472  ;;  %v492_v50 = vpop.xlane.xlu0 %491 }
 0x2bf   :  { %v484_v48 = vmul.f32 %v1713_v34, %v473_v35  ;;  %v752_v11 = vpop.permute.xlu2 %751 }
 0x2c1   :  { %v497_v54 = vsel %vm493_vm4, %v484_v48, %v492_v50 }
 0x2c2   :  { %516 = vmatpush.msra.mxu2 %v497_v54 }
 0x2c4   :  { %517 = vmatpush.msra.mxu2 %v496_v60 }
 0x2c6   :  { %518 = vmatpush.msra.mxu2 %v495_v63 }
 0x2c8   :  { %519 = vmatpush.msra.mxu2 %v494_v5 }
 0x2c9   :  { %1166 = vmatmul.msk.f32.vlgmr.msra.gmra.mxu2 %vm123_vm0, %v1729_v0 }
 0x2ca   :  { %705 = vmatpush.msrb.mxu2 %v1602_v24 }
 0x2cc   :  { %706 = vmatpush.msrb.mxu2 %v1607_v26 }
 0x2ce   :  { %707 = vmatpush.msrb.mxu2 %v1632_v38 }
 0x2d0   :  { %708 = vmatpush.msrb.mxu2 %v1705_v55 }
 0x2d1   :  { %1167 = vmatmul.msk.f32.gmra.mxu2 %vm123_vm0, %v1740_v59  ;;  %v754_v62 = vpop.permute.xlu0 %753 }
 0x2d2   :  { %1194 = vmatpush.msk.msrb.mxu1 %vm67_vm1, %v754_v62 }
 0x2d4   :  { %1195 = vmatpush.msk.msrb.mxu1 %vm67_vm1, %v752_v11 }
 0x2d5   :  { %1196 = vmatmul.msk.f32.vlgmr.msrb.gmra.mxu1 %vm123_vm0, %v1496_v20 }
 0x2d6   :  { %v682_v17 = vpop.permute.xlu1 %681 }
 0x2d7   :  { %1187 = vmatpush.msk.msra.mxu0 %vm62_vm2, %v682_v17 }
 0x2d8   :  { %1188 = vmatmul.msk.f32.vlgmr.msra.gmra.mxu0 %vm123_vm0, %v1510_v25 }
 0x2d9   :  { %1180 = vmatmul.msk.f32.vlgmr.msrb.gmra.mxu2 %vm123_vm0, %v1461_v6 }
 0x2dd   :  { %1197 = vmatmul.msk.f32.gmra.mxu1 %vm123_vm0, %v1517_v27 }
 0x2e0   :  { %1189 = vmatmul.msk.f32.gmra.mxu0 %vm123_vm0, %v1523_v28 }
 0x2e1   :  { %1181 = vmatmul.msk.f32.gmra.mxu2 %vm123_vm0, %v1467_v8 }
 0x2e5   :  { %1198 = vmatmul.msk.f32.gmra.mxu1 %vm123_vm0, %v1525_v29 }
 0x2e8   :  { %1190 = vmatmul.msk.f32.gmra.mxu0 %vm123_vm0, %v1531_v30 }
 0x2e9   :  { %1182 = vmatmul.msk.f32.gmra.mxu2 %vm123_vm0, %v1483_v14 }
 0x2ed   :  { %1199 = vmatmul.msk.f32.gmra.mxu1 %vm123_vm0, %v1533_v31 }
 0x2f0   :  { %1191 = vmatmul.msk.f32.gmra.mxu0 %vm123_vm0, %v1539_v32 }
 0x2f1   :  { %1183 = vmatmul.msk.f32.gmra.mxu2 %vm123_vm0, %v1457_v4 }
 0x34c   :  { %v521_v6 = vpop.f32.mrf.mxu2 }
 0x34d   :  { %v527_v28 = vmax.f32 %v521_v6, 0.0 }
 0x352   :  { %v780_v27 = vpop.f32.mrf.mxu1 }
 0x354   :  { %v524_v8 = vpop.f32.mrf.mxu2 }
 0x355   :  { %v528_v20 = vmax.f32 %v524_v8, 0.0  ;;  %v739_v25 = vpop.f32.mrf.mxu0 }
 0x357   :  { %556 = vmatpush.msrb.mxu3 %v528_v20  ;;  %v1805_v20 = vld [vmem:[%s1947_s6 + $0x10] sm:$0xff] }
 0x359   :  { %557 = vmatpush.msrb.mxu3 %v527_v28 }
 0x35a   :  { %v783_v14 = vpop.f32.mrf.mxu1 }
 0x35c   :  { %v710_v29 = vpop.f32.mrf.mxu2 }
 0x35d   :  { %v742_v30 = vpop.f32.mrf.mxu0  ;;  %v740_v62 = vadd.f32 %v739_v25, %v710_v29  ;;  %v1812_v25 = vld [vmem:[%s1947_s6 + $0x18] sm:$0xff] }
 0x35f   :  { %v792_v17 = vadd.f32 %v780_v27, %v740_v62 }
 0x362   :  { %v786_v35 = vpop.f32.mrf.mxu1 }
 0x364   :  { %v713_v18 = vpop.f32.mrf.mxu2 }
 0x365   :  { %v743_v21 = vadd.f32 %v742_v30, %v713_v18  ;;  %v745_v23 = vpop.f32.mrf.mxu0 }
 0x367   :  { %v793_v31 = vadd.f32 %v783_v14, %v743_v21 }
 0x369   :  { %v797_v32 = vadd.f32 %v793_v31, %v1543_v41 }
 0x36a   :  { %v789_v63 = vpop.f32.mrf.mxu1 }
 0x36b   :  { %v801_v37 = vmax.f32 %v797_v32, 0.0 }
 0x36c   :  { %v716_v4 = vpop.f32.mrf.mxu2 }
 0x36d   :  { %v746_v48 = vadd.f32 %v745_v23, %v716_v4  ;;  %806 = vrot.lane.b32.xlu2 %v801_v37, %s1369_s14  ;;  %v748_v54 = vpop.f32.mrf.mxu0 }
 0x36f   :  { %v794_v50 = vadd.f32 %v786_v35, %v746_v48 }
 0x371   :  { %v798_v52 = vadd.f32 %v794_v50, %v1547_v49  ;;  %v796_v49 = vadd.f32 %v792_v17, %v1554_v61  ;;  %v1798_v61 = vld [vmem:[%s1947_s6 + $0x8] sm:$0xff] }
 0x373   :  { %v802_v56 = vmax.f32 %v798_v52, 0.0  ;;  %v800_v8 = vmax.f32 %v796_v49, 0.0 }
 0x374   :  { %v719_v60 = vpop.f32.mrf.mxu2 }
 0x375   :  { %v749_v5 = vadd.f32 %v748_v54, %v719_v60  ;;  %878 = vrot.lane.b32.xlu2 %v802_v56, %s1368_s13  ;;  %808 = vrot.lane.b32.xlu0 %v802_v56, %s1369_s14 }
 0x377   :  { %v795_v41 = vadd.f32 %v789_v63, %v749_v5 }
 0x379   :  { %v799_v11 = vadd.f32 %v795_v41, %v1549_v51  ;;  %v1791_v51 = vld [vmem:[%s1947_s6] sm:$0xff] }
 0x37a   :  { %1168 = vmatmul.msk.f32.vlgmr.msrb.gmra.mxu3 %vm529_vm5, %v1791_v51 }
 0x37b   :  { %v803_v6 = vmax.f32 %v799_v11, 0.0 }
 0x37d   :  { %880 = vrot.lane.b32.xlu0 %v803_v6, %s1368_s13  ;;  %810 = vrot.lane.b32.xlu1 %v803_v6, %s1369_s14 }
 0x37e   :  { %828 = vmatpush.msra.mxu3 %v803_v6 }
 0x380   :  { %829 = vmatpush.msra.mxu3 %v802_v56 }
 0x382   :  { %830 = vmatpush.msra.mxu3 %v801_v37 }
 0x383   :  { %1169 = vmatmul.msk.f32.gmra.mxu3 %vm529_vm5, %v1798_v61 }
 0x384   :  { %831 = vmatpush.msra.mxu3 %v800_v8 }
 0x385   :  { %874 = vrot.lane.b32.xlu0 %v800_v8, %s1368_s13  ;;  %804 = vrot.lane.b32.xlu1 %v800_v8, %s1369_s14 }
 0x38b   :  { %1170 = vmatmul.msk.f32.gmra.mxu3 %vm529_vm5, %v1805_v20 }
 0x38d   :  { %876 = vrot.lane.b32.xlu1 %v801_v37, %s1368_s13 }
 0x393   :  { %1171 = vmatmul.msk.f32.gmra.mxu3 %vm529_vm5, %v1812_v25 }
 0x39b   :  { %1200 = vmatmul.msk.f32.vlgmr.msra.gmra.mxu3 %vm123_vm0, %v1575_v13 }
 0x3a3   :  { %1201 = vmatmul.msk.f32.gmra.mxu3 %vm123_vm0, %v1579_v15 }
 0x3ab   :  { %1202 = vmatmul.msk.f32.gmra.mxu3 %vm123_vm0, %v1583_v16 }
 0x3b3   :  { %1203 = vmatmul.msk.f32.gmra.mxu3 %vm123_vm0, %v1587_v19 }
 0x3c7   :  { %v807_v27 = vpop.permute.xlu2 %806 }
 0x3cf   :  { %v879_v14 = vpop.permute.xlu2 %878 }
 0x3e7   :  { %v809_v28 = vpop.permute.xlu0 %808 }
 0x3ef   :  { %v881_v29 = vpop.permute.xlu0 %880  ;;  %v811_v30 = vpop.permute.xlu1 %810 }
 0x3f0   :  { %1204 = vmatpush.msk.msra.mxu2 %vm62_vm2, %v811_v30  ;;  %1212 = vmatpush.msk.msrb.mxu0 %vm67_vm1, %v881_v29 }
 0x3f2   :  { %1205 = vmatpush.msk.msra.mxu2 %vm62_vm2, %v809_v28  ;;  %1213 = vmatpush.msk.msrb.mxu0 %vm67_vm1, %v879_v14 }
 0x3f4   :  { %1206 = vmatpush.msk.msra.mxu2 %vm62_vm2, %v807_v27 }
 0x3f7   :  { %v805_v13 = vpop.permute.xlu1 %804  ;;  %v875_v16 = vpop.permute.xlu0 %874 }
 0x3f8   :  { %1207 = vmatpush.msk.msra.mxu2 %vm62_vm2, %v805_v13 }
 0x3f9   :  { %1208 = vmatmul.msk.f32.vlgmr.msra.gmra.mxu2 %vm123_vm0, %v1611_v33 }
 0x3fd   :  { %v559_v9 = vpop.f32.mrf.mxu3 }
 0x3fe   :  { %v572_v5 = vsel %vm571_vm6, %v559_v9, 0.0 }
 0x3ff   :  { %v877_v15 = vpop.permute.xlu1 %876 }
 0x400   :  { %1214 = vmatpush.msk.msrb.mxu0 %vm67_vm1, %v877_v15 }
 0x401   :  { %1209 = vmatmul.msk.f32.gmra.mxu2 %vm123_vm0, %v1636_v39 }
 0x402   :  { %1215 = vmatpush.msk.msrb.mxu0 %vm67_vm1, %v875_v16 }
 0x403   :  { %1216 = vmatmul.msk.f32.vlgmr.msrb.gmra.mxu0 %vm123_vm0, %v1625_v36 }
 0x406   :  { %v562_v10 = vpop.f32.mrf.mxu3 }
 0x407   :  { %v575_v62 = vsel %vm571_vm6, %v562_v10, 0.0 }
 0x409   :  { %1210 = vmatmul.msk.f32.gmra.mxu2 %vm123_vm0, %v1648_v42 }
 0x40b   :  { %1217 = vmatmul.msk.f32.gmra.mxu0 %vm123_vm0, %v1644_v40 }
 0x40e   :  { %v565_v19 = vpop.f32.mrf.mxu3 }
 0x411   :  { %1211 = vmatmul.msk.f32.gmra.mxu2 %vm123_vm0, %v1656_v44 }
 0x413   :  { %1218 = vmatmul.msk.f32.gmra.mxu0 %vm123_vm0, %v1652_v43 }
 0x416   :  { %v568_v33 = vpop.f32.mrf.mxu3 }
 0x417   :  { %v581_v41 = vsel %vm571_vm6, %v568_v33, 0.0 }
 0x41b   :  { %1219 = vmatmul.msk.f32.gmra.mxu0 %vm123_vm0, %v1660_v45 }
 0x41e   :  { %v833_v36 = vpop.f32.mrf.mxu3 }
 0x426   :  { %v836_v18 = vpop.f32.mrf.mxu3 }
 0x42e   :  { %v839_v23 = vpop.f32.mrf.mxu3 }
 0x436   :  { %v842_v4 = vpop.f32.mrf.mxu3 }
 0x47c   :  { %v862_v39 = vpop.f32.mrf.mxu2 }
 0x47d   :  { %v863_v60 = vadd.f32 %v862_v39, %v833_v36 }
 0x480   :  { %v903_v42 = vpop.f32.mrf.mxu0 }
 0x481   :  { %v915_v63 = vadd.f32 %v903_v42, %v863_v60 }
 0x484   :  { %v865_v21 = vpop.f32.mrf.mxu2 }
 0x485   :  { %v866_v31 = vadd.f32 %v865_v21, %v836_v18 }
 0x488   :  { %v906_v40 = vpop.f32.mrf.mxu0 }
 0x489   :  { %v916_v32 = vadd.f32 %v906_v40, %v866_v31 }
 0x48b   :  { %v1857_v44 = vadd.f32 %v916_v32, %v1664_v46 }
 0x48c   :  { %v868_v43 = vpop.f32.mrf.mxu2 }
 0x48d   :  { %925 = vadd.xlane.f32.xlu2 %v1857_v44  ;;  %v869_v45 = vadd.f32 %v868_v43, %v839_v23 }
 0x490   :  { %v909_v35 = vpop.f32.mrf.mxu0 }
 0x491   :  { %v917_v37 = vadd.f32 %v909_v35, %v869_v45 }
 0x493   :  { %v1861_v48 = vadd.f32 %v917_v37, %v1682_v12  ;;  %v1871_v12 = vadd.f32 %v915_v63, %v1670_v57 }
 0x494   :  { %v871_v50 = vpop.f32.mrf.mxu2 }
 0x495   :  { %927 = vadd.xlane.f32.xlu1 %v1861_v48  ;;  %v872_v52 = vadd.f32 %v871_v50, %v842_v4 }
 0x498   :  { %v912_v54 = vpop.f32.mrf.mxu0 }
 0x499   :  { %v918_v56 = vadd.f32 %v912_v54, %v872_v52 }
 0x49b   :  { %v1865_v46 = vadd.f32 %v918_v56, %v1666_v47  ;;  %v578_v47 = vsel %vm571_vm6, %v565_v19, 0.0 }
 0x49d   :  { %939 = vmax.xlane.f32.xlu1 %v1861_v48  ;;  %941 = vmax.xlane.f32.xlu0 %v1865_v46 }
 0x49e   :  { %929 = vadd.xlane.f32.xlu2 %v1865_v46 }
 0x4a5   :  { %935 = vmax.xlane.f32.xlu1 %v1871_v12  ;;  %923 = vadd.xlane.f32.xlu0 %v1871_v12 }
 0x4a6   :  { %937 = vmax.xlane.f32.xlu2 %v1857_v44 }
 0x4ad   :  { %579 = vadd.xlane.f32.xlu1 %v578_v47  ;;  %573 = vadd.xlane.f32.xlu0 %v572_v5 }
 0x4ae   :  { %576 = vadd.xlane.f32.xlu2 %v575_v62 }
 0x4b5   :  { %582 = vadd.xlane.f32.xlu0 %v581_v41 }
 0x500   :  { %v926_v11 = vpop.xlane.xlu2 %925 }
 0x501   :  { %v932_v30 = vmul.f32 %v926_v11, %v1713_v34 }
 0x508   :  { %v928_v57 = vpop.xlane.xlu1 %927 }
 0x509   :  { %v933_v27 = vmul.f32 %v928_v57, %v1713_v34 }
 0x510   :  { %v940_v17 = vpop.xlane.xlu1 %939  ;;  %v942_v6 = vpop.xlane.xlu0 %941 }
 0x511   :  { %v930_v49 = vpop.xlane.xlu2 %929  ;;  %v945_v29 = vsel %vm493_vm4, %v933_v27, %v940_v17 }
 0x512   :  { %v934_v8 = vmul.f32 %v930_v49, %v1713_v34 }
 0x514   :  { %v946_v28 = vsel %vm493_vm4, %v934_v8, %v942_v6 }
 0x515   :  { %959 = vmatpush.msra.mxu1 %v946_v28 }
 0x517   :  { %960 = vmatpush.msra.mxu1 %v945_v29 }
 0x518   :  { %v936_v14 = vpop.xlane.xlu1 %935  ;;  %v924_v13 = vpop.xlane.xlu0 %923 }
 0x519   :  { %v931_v15 = vmul.f32 %v924_v13, %v1713_v34  ;;  %v938_v16 = vpop.xlane.xlu2 %937 }
 0x51a   :  { %v944_v9 = vsel %vm493_vm4, %v932_v30, %v938_v16 }
 0x51b   :  { %961 = vmatpush.msra.mxu1 %v944_v9  ;;  %v943_v10 = vsel %vm493_vm4, %v931_v15, %v936_v14 }
 0x51d   :  { %962 = vmatpush.msra.mxu1 %v943_v10 }
 0x51e   :  { %1220 = vmatmul.msk.f32.vlgmr.msra.gmra.mxu1 %vm123_vm0, %v1729_v0 }
 0x520   :  { %v580_v19 = vpop.xlane.xlu1 %579  ;;  %v574_v33 = vpop.xlane.xlu0 %573 }
 0x521   :  { %v1174_v36 = vmul.f32 -1.442695, %v580_v19  ;;  %v1172_v39 = vmul.f32 -1.442695, %v574_v33  ;;  %v577_v18 = vpop.xlane.xlu2 %576 }
 0x522   :  { %v1173_v42 = vmul.f32 -1.442695, %v577_v18 }
 0x523   :  { %1252 = vpow2.f32 %v1174_v36 }
 0x524   :  { %1254 = vpow2.f32 %v1172_v39 }
 0x525   :  { %1256 = vpow2.f32 %v1173_v42 }
 0x526   :  { %1221 = vmatmul.msk.f32.gmra.mxu1 %vm123_vm0, %v1740_v59 }
 0x528   :  { %v583_v34 = vpop.xlane.xlu0 %582 }
 0x529   :  { %v1253_v21 = vpop.eup %1252  ;;  %v1175_v7 = vmul.f32 -1.442695, %v583_v34 }
 0x52a   :  { %v1255_v31 = vpop.eup %1254  ;;  %v598_v40 = vadd.f32 1.0, %v1253_v21 }
 0x52b   :  { %v1257_v23 = vpop.eup %1256  ;;  %v596_v32 = vadd.f32 1.0, %v1255_v31  ;;  %1258 = vpow2.f32 %v1175_v7 }
 0x52c   :  { %1260 = vrcp.f32 %v598_v40  ;;  %v597_v0 = vadd.f32 1.0, %v1257_v23  ;;  %v639_v52 = vand.u32 2147483647, %v598_v40  ;;  %v641_v54 = vand.u32 2147483648, %v598_v40 }
 0x52d   :  { %1262 = vrcp.f32 %v596_v32  ;;  %v609_v63 = vand.u32 2147483647, %v596_v32  ;;  %v611_v47 = vand.u32 2147483648, %v596_v32  ;;  %vm635_vm7 = vweird.f32 %v598_v40 }
 0x52e   :  { %1264 = vrcp.f32 %v597_v0  ;;  %vm605_vm9 = vweird.f32 %v596_v32  ;;  %v624_v57 = vand.u32 2147483647, %v597_v0  ;;  %vm640_vm11 = vcmp.eq.f32.partialorder %v639_v52, 8.507059e+37 }
 0x52f   :  { %v642_v17 = vor.u32 1.1754944e-38, %v641_v54  ;;  %vm610_vm13 = vcmp.eq.f32.partialorder %v609_v63, 8.507059e+37  ;;  %v612_v27 = vor.u32 1.1754944e-38, %v611_v47  ;;  %v626_v28 = vand.u32 2147483648, %v597_v0 }
 0x530   :  { %vm620_vm0 = vweird.f32 %v597_v0  ;;  %vm625_vm1 = vcmp.eq.f32.partialorder %v624_v57, 8.507059e+37 }
 0x531   :  { %v1259_v43 = vpop.eup %1258  ;;  %v627_v36 = vor.u32 1.1754944e-38, %v626_v28 }
 0x532   :  { %v1261_v45 = vpop.eup %1260  ;;  %v1896_v35 = vadd.f32 1.0, %v1259_v43 }
 0x533   :  { %v1263_v37 = vpop.eup %1262  ;;  %v631_v4 = vmul.f32 %v1261_v45, %v598_v40  ;;  %vm636_vm8 = vweird.f32 %v1261_v45 }
 0x534   :  { %v601_v50 = vmul.f32 %v1263_v37, %v596_v32  ;;  %1266 = vrcp.f32 %v1896_v35  ;;  %v1265_v56 = vpop.eup %1264  ;;  %vm606_vm10 = vweird.f32 %v1263_v37  ;;  %vm637_vm12 = vmor %vm635_vm7, %vm636_vm8  ;;  %v654_v39 = vand.u32 2147483647, %v1896_v35 }
 0x535   :  { %v632_v59 = vsub.f32 1.0, %v631_v4  ;;  %v616_v62 = vmul.f32 %v1265_v56, %v597_v0  ;;  %vm607_vm14 = vmor %vm605_vm9, %vm606_vm10  ;;  %vm621_vm15 = vweird.f32 %v1265_v56  ;;  %v656_v18 = vand.u32 2147483648, %v1896_v35 }
 0x536   :  { %v602_v60 = vsub.f32 1.0, %v601_v50  ;;  %vm622_vm2 = vmor %vm620_vm0, %vm621_vm15  ;;  %vm650_vm4 = vweird.f32 %v1896_v35  ;;  %vm655_vm8 = vcmp.eq.f32.partialorder %v654_v39, 8.507059e+37 }
 0x537   :  { %v633_v5 = vmul.f32 %v1261_v45, %v632_v59  ;;  %v617_v6 = vsub.f32 1.0, %v616_v62  ;;  %v657_v32 = vor.u32 1.1754944e-38, %v656_v18 }
 0x538   :  { %v603_v41 = vmul.f32 %v1263_v37, %v602_v60 }
 0x539   :  { %v634_v11 = vadd.f32 %v1261_v45, %v633_v5  ;;  %v618_v30 = vmul.f32 %v1265_v56, %v617_v6 }
 0x53a   :  { %v1267_v49 = vpop.eup %1266  ;;  %v604_v8 = vadd.f32 %v1263_v37, %v603_v41 }
 0x53b   :  { %v638_v29 = vsel %vm637_vm12, %v1261_v45, %v634_v11  ;;  %v646_v14 = vmul.f32 %v1267_v49, %v1896_v35  ;;  %v619_v10 = vadd.f32 %v1265_v56, %v618_v30  ;;  %vm651_vm3 = vweird.f32 %v1267_v49 }
 0x53c   :  { %v643_v13 = vsel %vm640_vm11, %v642_v17, %v638_v29  ;;  %v608_v15 = vsel %vm607_vm14, %v1263_v37, %v604_v8  ;;  %vm652_vm7 = vmor %vm650_vm4, %vm651_vm3 }
 0x53d   :  { %v662_v16 = vmul.f32 %v643_v13, %v1685_v22  ;;  %v613_v9 = vsel %vm610_vm13, %v612_v27, %v608_v15  ;;  %v647_v19 = vsub.f32 1.0, %v646_v14  ;;  %v623_v34 = vsel %vm622_vm2, %v1265_v56, %v619_v10 }
 0x53e   :  { %v660_v33 = vmul.f32 %v613_v9, %v1673_v58  ;;  %v628_v31 = vsel %vm625_vm1, %v627_v36, %v623_v34 }
 0x53f   :  { %v666_v42 = vadd.f32 %v662_v16, %v1433_v1  ;;  %v648_v21 = vmul.f32 %v1267_v49, %v647_v19  ;;  %v661_v40 = vmul.f32 %v628_v31, %v1678_v2  ;;  %v1284_v1 = vld [vmem:[%s1941_s0 + $0x8] sm:$0xff]  ;;  %v1285_v2 = vld [vmem:[%s1941_s0 + $0x18] sm:$0xff]  ;;  %s1372_s0 = smov [#allocation7]  }
 0x540   :  { %v664_v7 = vadd.f32 %v660_v33, %v1445_v3  ;;  %s1110_s12 = sshll.u32 %s1372_s0, 4  ;;  %s1111_s12 = int_to_ptr.vmem [resolvable:$true] %s1110_s12 }
 0x541   :  { %v670_v22 = vmax.f32 %v666_v42, 0.0  ;;  %v649_v23 = vadd.f32 %v1267_v49, %v648_v21  ;;  %v665_v0 = vadd.f32 %v1284_v1, %v661_v40 }
 0x542   :  { %v668_v58 = vmax.f32 %v664_v7, 0.0 }
 0x543   :  { %674 = vst [vmem:[#allocation7 + $0x10] sm:$0xff] %v670_v22  ;;  %v653_v43 = vsel %vm652_vm7, %v1267_v49, %v649_v23  ;;  %v669_v45 = vmax.f32 %v665_v0, 0.0 }
 0x544   :  { %672 = vst [vmem:[#allocation7] sm:$0xff] %v668_v58  ;;  %v658_v3 = vsel %vm655_vm8, %v657_v32, %v653_v43 }
 0x545   :  { %v663_v37 = vmul.f32 %v658_v3, %v1696_v53  ;;  %673 = vst [vmem:[#allocation7 + $0x8] sm:$0xff] %v669_v45 }
 0x547   :  { %v667_v35 = vadd.f32 %v1285_v2, %v663_v37 }
 0x549   :  { %v671_v4 = vmax.f32 %v667_v35, 0.0 }
 0x54b   :  { %675 = vst [vmem:[#allocation7 + $0x18] sm:$0xff] %v671_v4 }
 0x59b   :  { %v964_v50 = vpop.f32.mrf.mxu1 }
 0x59c   :  { %v970_v54 = vmax.f32 %v964_v50, 0.0 }
 0x5a3   :  { %v967_v59 = vpop.f32.mrf.mxu1 }
 0x5a4   :  { %v971_v52 = vmax.f32 %v967_v59, 0.0 }
 0x5a6   :  { %986 = vmatpush.msrb.mxu3 %v971_v52 }
 0x5a8   :  { %987 = vmatpush.msrb.mxu3 %v970_v54 }
 0x5a9   :  { %1222 = vmatmul.msk.f32.vlgmr.msrb.gmra.mxu3 %vm529_vm5, %v1791_v51 }
 0x5b1   :  { %1223 = vmatmul.msk.f32.gmra.mxu3 %vm529_vm5, %v1798_v61 }
 0x5b9   :  { %1224 = vmatmul.msk.f32.gmra.mxu3 %vm529_vm5, %v1805_v20 }
 0x5c1   :  { %1225 = vmatmul.msk.f32.gmra.mxu3 %vm529_vm5, %v1812_v25 }
 0x62c   :  { %v989_v53 = vpop.f32.mrf.mxu3 }
 0x62d   :  { %v1001_v56 = vsel %vm571_vm6, %v989_v53, 0.0 }
 0x62e   :  { %1002 = vadd.xlane.f32.xlu2 %v1001_v56 }
 0x634   :  { %v992_v60 = vpop.f32.mrf.mxu3 }
 0x635   :  { %v1004_v63 = vsel %vm571_vm6, %v992_v60, 0.0 }
 0x636   :  { %1005 = vadd.xlane.f32.xlu1 %v1004_v63 }
 0x63c   :  { %v995_v47 = vpop.f32.mrf.mxu3 }
 0x63d   :  { %v1007_v51 = vsel %vm571_vm6, %v995_v47, 0.0 }
 0x63e   :  { %1008 = vadd.xlane.f32.xlu0 %v1007_v51 }
 0x644   :  { %v998_v5 = vpop.f32.mrf.mxu3 }
 0x645   :  { %v1010_v61 = vsel %vm571_vm6, %v998_v5, 0.0 }
 0x646   :  { %1011 = vadd.xlane.f32.xlu2 %v1010_v61 }
 0x6a1   :  { %v1003_v20 = vpop.xlane.xlu2 %1002 }
 0x6a2   :  { %v1226_v62 = vmul.f32 -1.442695, %v1003_v20 }
 0x6a4   :  { %1268 = vpow2.f32 %v1226_v62 }
 0x6a9   :  { %v1006_v25 = vpop.xlane.xlu1 %1005 }
 0x6aa   :  { %v1269_v41 = vpop.eup %1268  ;;  %v1227_v57 = vmul.f32 -1.442695, %v1006_v25 }
 0x6ab   :  { %v1025_v11 = vadd.f32 1.0, %v1269_v41 }
 0x6ac   :  { %1270 = vpow2.f32 %v1227_v57 }
 0x6ad   :  { %1272 = vrcp.f32 %v1025_v11  ;;  %v1040_v30 = vand.u32 2147483648, %v1025_v11  ;;  %v1038_v13 = vand.u32 2147483647, %v1025_v11  ;;  %vm1034_vm6 = vweird.f32 %v1025_v11 }
 0x6af   :  { %v1041_v33 = vor.u32 1.1754944e-38, %v1040_v30  ;;  %vm1039_vm10 = vcmp.eq.f32.partialorder %v1038_v13, 8.507059e+37 }
 0x6b1   :  { %v1009_v17 = vpop.xlane.xlu0 %1008 }
 0x6b2   :  { %v1271_v6 = vpop.eup %1270  ;;  %v1228_v49 = vmul.f32 -1.442695, %v1009_v17 }
 0x6b3   :  { %v1273_v8 = vpop.eup %1272  ;;  %v1026_v27 = vadd.f32 1.0, %v1271_v6 }
 0x6b4   :  { %v1030_v28 = vmul.f32 %v1273_v8, %v1025_v11  ;;  %1274 = vpow2.f32 %v1228_v49  ;;  %vm1035_vm5 = vweird.f32 %v1273_v8 }
 0x6b5   :  { %1276 = vrcp.f32 %v1026_v27  ;;  %vm1036_vm9 = vmor %vm1034_vm6, %vm1035_vm5  ;;  %v1055_v7 = vand.u32 2147483648, %v1026_v27  ;;  %v1053_v40 = vand.u32 2147483647, %v1026_v27  ;;  %vm1049_vm12 = vweird.f32 %v1026_v27 }
 0x6b6   :  { %v1031_v29 = vsub.f32 1.0, %v1030_v28 }
 0x6b7   :  { %v1056_v0 = vor.u32 1.1754944e-38, %v1055_v7  ;;  %vm1054_vm14 = vcmp.eq.f32.partialorder %v1053_v40, 8.507059e+37 }
 0x6b8   :  { %v1032_v14 = vmul.f32 %v1273_v8, %v1031_v29 }
 0x6b9   :  { %v1012_v15 = vpop.xlane.xlu2 %1011 }
 0x6ba   :  { %v1275_v16 = vpop.eup %1274  ;;  %v1033_v9 = vadd.f32 %v1273_v8, %v1032_v14  ;;  %v1229_v10 = vmul.f32 -1.442695, %v1012_v15 }
 0x6bb   :  { %v1277_v19 = vpop.eup %1276  ;;  %v1027_v36 = vadd.f32 1.0, %v1275_v16 }
 0x6bc   :  { %v1037_v39 = vsel %vm1036_vm9, %v1273_v8, %v1033_v9  ;;  %v1045_v18 = vmul.f32 %v1277_v19, %v1026_v27  ;;  %1278 = vpow2.f32 %v1229_v10  ;;  %vm1050_vm11 = vweird.f32 %v1277_v19 }
 0x6bd   :  { %v1042_v42 = vsel %vm1039_vm10, %v1041_v33, %v1037_v39  ;;  %1280 = vrcp.f32 %v1027_v36  ;;  %vm1051_vm13 = vmor %vm1049_vm12, %vm1050_vm11  ;;  %v1070_v2 = vand.u32 2147483648, %v1027_v36  ;;  %v1068_v50 = vand.u32 2147483647, %v1027_v36 }
 0x6be   :  { %v1089_v34 = vmul.f32 %v1042_v42, %v1871_v12  ;;  %v1046_v21 = vsub.f32 1.0, %v1045_v18  ;;  %vm1064_vm0 = vweird.f32 %v1027_v36 }
 0x6bf   :  { %v1071_v53 = vor.u32 1.1754944e-38, %v1070_v2  ;;  %vm1069_vm2 = vcmp.eq.f32.partialorder %v1068_v50, 8.507059e+37 }
 0x6c0   :  { %v1093_v31 = vadd.f32 %v1705_v55, %v1089_v34  ;;  %v1047_v22 = vmul.f32 %v1277_v19, %v1046_v21 }
 0x6c2   :  { %v1279_v23 = vpop.eup %1278  ;;  %v1097_v58 = vmax.f32 %v1093_v31, 0.0  ;;  %v1048_v32 = vadd.f32 %v1277_v19, %v1047_v22 }
 0x6c3   :  { %v1281_v1 = vpop.eup %1280  ;;  %v1028_v43 = vadd.f32 1.0, %v1279_v23 }
 0x6c4   :  { %1102 = vst [vmem:[#allocation7 + $0x20] sm:$0xff] %v1097_v58  ;;  %v1052_v3 = vsel %vm1051_vm13, %v1277_v19, %v1048_v32  ;;  %v1060_v45 = vmul.f32 %v1281_v1, %v1027_v36  ;;  %vm1065_vm15 = vweird.f32 %v1281_v1 }
 0x6c5   :  { %v1057_v12 = vsel %vm1054_vm14, %v1056_v0, %v1052_v3  ;;  %1282 = vrcp.f32 %v1028_v43  ;;  %vm1066_vm1 = vmor %vm1064_vm0, %vm1065_vm15  ;;  %v1085_v51 = vand.u32 2147483648, %v1028_v43  ;;  %v1083_v61 = vand.u32 2147483647, %v1028_v43 }
 0x6c6   :  { %v1090_v37 = vmul.f32 %v1057_v12, %v1857_v44  ;;  %v1061_v55 = vsub.f32 1.0, %v1060_v45  ;;  %vm1079_vm4 = vweird.f32 %v1028_v43 }
 0x6c7   :  { %v1086_v25 = vor.u32 1.1754944e-38, %v1085_v51  ;;  %vm1084_vm8 = vcmp.eq.f32.partialorder %v1083_v61, 8.507059e+37 }
 0x6c8   :  { %v1094_v35 = vadd.f32 %v1632_v38, %v1090_v37  ;;  %v1062_v4 = vmul.f32 %v1281_v1, %v1061_v55 }
 0x6ca   :  { %v1098_v59 = vmax.f32 %v1094_v35, 0.0  ;;  %v1063_v52 = vadd.f32 %v1281_v1, %v1062_v4 }
 0x6cb   :  { %v1283_v54 = vpop.eup %1282 }
 0x6cc   :  { %1103 = vst [vmem:[#allocation7 + $0x28] sm:$0xff] %v1098_v59  ;;  %v1067_v56 = vsel %vm1066_vm1, %v1281_v1, %v1063_v52  ;;  %v1075_v60 = vmul.f32 %v1283_v54, %v1028_v43  ;;  %vm1080_vm3 = vweird.f32 %v1283_v54 }
 0x6cd   :  { %v1072_v63 = vsel %vm1069_vm2, %v1071_v53, %v1067_v56  ;;  %vm1081_vm7 = vmor %vm1079_vm4, %vm1080_vm3 }
 0x6ce   :  { %v1091_v44 = vmul.f32 %v1072_v63, %v1861_v48  ;;  %v1076_v47 = vsub.f32 1.0, %v1075_v60 }
 0x6d0   :  { %v1095_v38 = vadd.f32 %v1607_v26, %v1091_v44  ;;  %v1077_v5 = vmul.f32 %v1283_v54, %v1076_v47 }
 0x6d2   :  { %v1099_v20 = vmax.f32 %v1095_v38, 0.0  ;;  %v1078_v62 = vadd.f32 %v1283_v54, %v1077_v5 }
 0x6d4   :  { %1104 = vst [vmem:[#allocation7 + $0x30] sm:$0xff] %v1099_v20  ;;  %v1082_v41 = vsel %vm1081_vm7, %v1283_v54, %v1078_v62 }
 0x6d5   :  { %v1087_v57 = vsel %vm1084_vm8, %v1086_v25, %v1082_v41 }
 0x6d6   :  { %v1092_v11 = vmul.f32 %v1087_v57, %v1865_v46 }
 0x6d8   :  { %v1096_v26 = vadd.f32 %v1602_v24, %v1092_v11 }
 0x6da   :  { %v1100_v48 = vmax.f32 %v1096_v26, 0.0 }
 0x6dc   :  { %1105 = vst [vmem:[#allocation7 + $0x38] sm:$0xff] %v1100_v48 }
 0x6dd   :  { %1118 = dma.vmem_to_hbm [thread:$0]  %s1111_s12, 1024, %s1113_s4, [#allocation4], %s1365_s9, %s1365_s9, %s1366_s10  }
 0x6de   :  { %1362 = dma.done.wait [#allocation4], 1024  }
 0x6df   :  { %1363 = vsyncadd [#allocation4], 4294966272 }
 0x6e0   :  { %1123 = vsyncpa [#allocation3], 1 }
 0x6e1   :  { %1124 = vsyncpa [#allocation6], 1 }
 0x6e2   :  { %1125 = vsyncpa [#allocation4], 1 }

</bundles_post_ra>
